<compile_context>
chip_gen: v7x
topology: tpu7x:2x2x1
jax: 0.10.0
libtpu: 0.0.40
codegen_flags: <defaults>
</compile_context>

<pallas_src>
import math

import jax
import jax.numpy as jnp
from jax import lax
from jax.experimental import pallas as pl
from jax.experimental.pallas import tpu as pltpu

# ---------------- small BERT-like config ----------------
VOCAB = 128
TYPE_VOCAB = 2
MAX_POS = 16
HIDDEN = 32
NUM_HEADS = 4
HEAD_DIM = HIDDEN // NUM_HEADS
FFN = 64
NUM_LAYERS = 2
LN_EPS = 1e-12
BATCH = 2
SEQ = 8
SCALE = 1.0 / math.sqrt(HEAD_DIM)


# ---------------- in-kernel helpers (pure value math) ----------------
def _gelu(x):
    # TODO(synk): HF BERT (bge) uses exact erf-GELU; tanh approximation used here.
    c = 0.7978845608028654  # sqrt(2/pi)
    return 0.5 * x * (1.0 + jnp.tanh(c * (x + 0.044715 * x * x * x)))


def _layernorm(x, g, b):
    mu = jnp.mean(x, axis=-1, keepdims=True)
    var = jnp.mean(jnp.square(x - mu), axis=-1, keepdims=True)
    return (x - mu) * lax.rsqrt(var + LN_EPS) * g + b


# ---------------- fused encoder kernel ----------------
def _encoder_kernel(x_emb_ref, bias_ref, emb_ln_g_ref, emb_ln_b_ref,
                    wqkv_ref, bqkv_ref, wo_ref, bo_ref,
                    ln1_g_ref, ln1_b_ref, w1_ref, b1_ref,
                    w2_ref, b2_ref, ln2_g_ref, ln2_b_ref,
                    out_ref, x_scratch):
    layer = pl.program_id(0)

    # Layer 0: embeddings LayerNorm (no residual), result kept in VMEM scratch.
    @pl.when(layer == 0)
    def _():
        x_scratch[...] = _layernorm(
            x_emb_ref[...], emb_ln_g_ref[...], emb_ln_b_ref[...])

    x = x_scratch[...]                          # (B*S, H) resident activations

    # Fused QKV projection: one (B*S, H) @ (H, 3H) MXU pass.
    qkv = jnp.dot(x, wqkv_ref[...],
                  preferred_element_type=jnp.float32) + bqkv_ref[...]

    # (B*S, B*S) additive bias: -1e9 on cross-batch pairs and padded keys,
    # 0 elsewhere.  Lets attention run over the flattened batch*seq axis
    # (invalid keys underflow to exactly 0 after exp), so no batch loop.
    bias = bias_ref[...]

    head_ctx = []
    for h in range(NUM_HEADS):
        c0 = h * HEAD_DIM
        q = qkv[:, c0:c0 + HEAD_DIM]
        k = qkv[:, HIDDEN + c0:HIDDEN + c0 + HEAD_DIM]
        v = qkv[:, 2 * HIDDEN + c0:2 * HIDDEN + c0 + HEAD_DIM]
        s = lax.dot_general(q, k, (((1,), (1,)), ((), ())),
                            preferred_element_type=jnp.float32)
        s = s * SCALE + bias                    # (B*S, B*S)
        m = jnp.max(s, axis=-1, keepdims=True)
        p = jnp.exp(s - m)
        denom = jnp.sum(p, axis=-1, keepdims=True)
        p = p * pl.reciprocal(denom, approx=True)
        head_ctx.append(jnp.dot(p, v, preferred_element_type=jnp.float32))
    ctx = jnp.concatenate(head_ctx, axis=-1)    # (B*S, H)

    # Output projection + add & LayerNorm.
    attn_out = jnp.dot(ctx, wo_ref[...],
                       preferred_element_type=jnp.float32) + bo_ref[...]
    x = _layernorm(attn_out + x, ln1_g_ref[...], ln1_b_ref[...])

    # FFN (GELU) + add & LayerNorm.
    hdn = _gelu(jnp.dot(x, w1_ref[...],
                        preferred_element_type=jnp.float32) + b1_ref[...])
    ff = jnp.dot(hdn, w2_ref[...],
                 preferred_element_type=jnp.float32) + b2_ref[...]
    x = _layernorm(ff + x, ln2_g_ref[...], ln2_b_ref[...])

    x_scratch[...] = x                          # carry to next layer

    # Final layer: take CLS rows and L2-normalize (torch.nn.functional.normalize).
    @pl.when(layer == pl.num_programs(0) - 1)
    def _():
        cls = jnp.concatenate(
            [x[b * SEQ:b * SEQ + 1, :] for b in range(BATCH)], axis=0)  # (B, H)
        nrm = jnp.sqrt(jnp.sum(cls * cls, axis=-1, keepdims=True))
        out_ref[...] = cls / jnp.maximum(nrm, 1e-12)


# ---------------- deterministic parameter init (stacked per-layer) ----------------
def init_params(key):
    keys = iter(jax.random.split(key, 4 + NUM_LAYERS * 6))

    def nrm(shape):
        return 0.02 * jax.random.normal(next(keys), shape, jnp.float32)

    params = {
        "word_emb": nrm((VOCAB, HIDDEN)),
        "pos_emb": nrm((MAX_POS, HIDDEN)),
        "type_emb": nrm((TYPE_VOCAB, HIDDEN)),
        "emb_ln_g": jnp.ones((1, HIDDEN), jnp.float32),
        "emb_ln_b": jnp.zeros((1, HIDDEN), jnp.float32),
    }

    wqkv, wo, w1, w2 = [], [], [], []
    for _ in range(NUM_LAYERS):
        wqkv.append(jnp.concatenate(
            [nrm((HIDDEN, HIDDEN)), nrm((HIDDEN, HIDDEN)), nrm((HIDDEN, HIDDEN))],
            axis=1))                                           # (H, 3H)
        wo.append(nrm((HIDDEN, HIDDEN)))
        w1.append(nrm((HIDDEN, FFN)))
        w2.append(nrm((FFN, HIDDEN)))

    params.update(
        wqkv=jnp.stack(wqkv),                                  # (L, H, 3H)
        bqkv=jnp.zeros((NUM_LAYERS, 1, 3 * HIDDEN), jnp.float32),
        wo=jnp.stack(wo),
        bo=jnp.zeros((NUM_LAYERS, 1, HIDDEN), jnp.float32),
        ln1_g=jnp.ones((NUM_LAYERS, 1, HIDDEN), jnp.float32),
        ln1_b=jnp.zeros((NUM_LAYERS, 1, HIDDEN), jnp.float32),
        w1=jnp.stack(w1),
        b1=jnp.zeros((NUM_LAYERS, 1, FFN), jnp.float32),
        w2=jnp.stack(w2),
        b2=jnp.zeros((NUM_LAYERS, 1, HIDDEN), jnp.float32),
        ln2_g=jnp.ones((NUM_LAYERS, 1, HIDDEN), jnp.float32),
        ln2_b=jnp.zeros((NUM_LAYERS, 1, HIDDEN), jnp.float32),
    )
    return params


# ---------------- forward: embedding gathers in JAX, everything else fused ----------------
def embedding_model_forward(params, input_ids, attention_mask, token_type_ids):
    B, S = input_ids.shape
    f32 = jnp.float32

    # Embedding gathers (glue) -> (B*S, H).
    x = (params["word_emb"][input_ids]
         + params["pos_emb"][jnp.arange(S)][None, :, :]
         + params["type_emb"][token_type_ids])
    x_emb = x.reshape(B * S, HIDDEN).astype(f32)

    # Block-diagonal + key-padding additive bias over the flattened (B*S) axis:
    #   0 where query and key are in the same batch item AND the key is valid,
    #   -1e9 otherwise.  Tiny (B*S, B*S) tensor, built once.
    key_valid = attention_mask.astype(f32).reshape(B * S)          # (B*S,)
    batch_ids = jnp.repeat(jnp.arange(B), S)                       # (B*S,)
    same_batch = (batch_ids[:, None] == batch_ids[None, :]).astype(f32)
    bias = (1.0 - same_batch * key_valid[None, :]) * -1e9          # (B*S, B*S)

    const2d = lambda shape: pl.BlockSpec(shape, lambda l: (0, 0))
    stacked = lambda *dims: pl.BlockSpec((None,) + dims, lambda l: (l, 0, 0))

    grid_spec = pltpu.PrefetchScalarGridSpec(
        num_scalar_prefetch=0,
        grid=(NUM_LAYERS,),
        in_specs=[
            const2d((B * S, HIDDEN)),      # x_emb
            const2d((B * S, B * S)),       # attention bias
            const2d((1, HIDDEN)),          # emb_ln_g
            const2d((1, HIDDEN)),          # emb_ln_b
            stacked(HIDDEN, 3 * HIDDEN),   # wqkv
            stacked(1, 3 * HIDDEN),        # bqkv
            stacked(HIDDEN, HIDDEN),       # wo
            stacked(1, HIDDEN),            # bo
            stacked(1, HIDDEN),            # ln1_g
            stacked(1, HIDDEN),            # ln1_b
            stacked(HIDDEN, FFN),          # w1
            stacked(1, FFN),               # b1
            stacked(FFN, HIDDEN),          # w2
            stacked(1, HIDDEN),            # b2
            stacked(1, HIDDEN),            # ln2_g
            stacked(1, HIDDEN),            # ln2_b
        ],
        out_specs=pl.BlockSpec((B, HIDDEN), lambda l: (0, 0)),
        scratch_shapes=[pltpu.VMEM((B * S, HIDDEN), f32)],
    )

    return pl.pallas_call(
        _encoder_kernel,
        out_shape=jax.ShapeDtypeStruct((B, HIDDEN), f32),
        grid_spec=grid_spec,
        compiler_params=pltpu.CompilerParams(
            dimension_semantics=("arbitrary",)),
    )(x_emb, bias,
      params["emb_ln_g"], params["emb_ln_b"],
      params["wqkv"], params["bqkv"], params["wo"], params["bo"],
      params["ln1_g"], params["ln1_b"], params["w1"], params["b1"],
      params["w2"], params["b2"], params["ln2_g"], params["ln2_b"])


if __name__ == "__main__":
    key = jax.random.PRNGKey(0)
    pkey, ikey = jax.random.split(key)
    params = init_params(pkey)

    input_ids = jax.random.randint(ikey, (BATCH, SEQ), 0, VOCAB, dtype=jnp.int32)
    attention_mask = jnp.array(
        [[1] * SEQ, [1] * (SEQ - 2) + [0, 0]], dtype=jnp.int32)  # batch 1 padded
    token_type_ids = jnp.zeros((BATCH, SEQ), dtype=jnp.int32)

    fwd = jax.jit(embedding_model_forward)
    out = jax.block_until_ready(
        fwd(params, input_ids, attention_mask, token_type_ids))

    assert out.shape == (BATCH, HIDDEN)
    # rows are unit-norm (L2 normalize of CLS token)
    assert bool(jnp.all(jnp.abs(jnp.linalg.norm(out, axis=1) - 1.0) < 1e-4))
    print("KERNEL_OK")
</pallas_src>

<mosaic_0001>
module attributes {stable_mosaic.version = 11 : i64} {
  func.func @_encoder_kernel(%arg0: i32, %arg1: memref<16x32xf32, #tpu.memory_space<vmem>>, %arg2: memref<16x16xf32, #tpu.memory_space<vmem>>, %arg3: memref<1x32xf32, #tpu.memory_space<vmem>>, %arg4: memref<1x32xf32, #tpu.memory_space<vmem>>, %arg5: memref<1x32x96xf32, #tpu.memory_space<vmem>>, %arg6: memref<1x1x96xf32, #tpu.memory_space<vmem>>, %arg7: memref<1x32x32xf32, #tpu.memory_space<vmem>>, %arg8: memref<1x1x32xf32, #tpu.memory_space<vmem>>, %arg9: memref<1x1x32xf32, #tpu.memory_space<vmem>>, %arg10: memref<1x1x32xf32, #tpu.memory_space<vmem>>, %arg11: memref<1x32x64xf32, #tpu.memory_space<vmem>>, %arg12: memref<1x1x64xf32, #tpu.memory_space<vmem>>, %arg13: memref<1x64x32xf32, #tpu.memory_space<vmem>>, %arg14: memref<1x1x32xf32, #tpu.memory_space<vmem>>, %arg15: memref<1x1x32xf32, #tpu.memory_space<vmem>>, %arg16: memref<1x1x32xf32, #tpu.memory_space<vmem>>, %arg17: memref<2x32xf32, #tpu.memory_space<vmem>>, %arg18: memref<16x32xf32, #tpu.memory_space<vmem>>) attributes {dimension_semantics = [#tpu.dimension_semantics<arbitrary>], iteration_bounds = array<i64: 2>, scalar_prefetch = 0 : i64, scratch_operands = 1 : i64, tpu.core_type = #tpu.core_type<tc>, window_params = [{pipeline_mode = #tpu.pipeline_mode<synchronous>, transform_indices = @transform_0, window_bounds = array<i64: 16, 32>}, {pipeline_mode = #tpu.pipeline_mode<synchronous>, transform_indices = @transform_1, window_bounds = array<i64: 16, 16>}, {pipeline_mode = #tpu.pipeline_mode<synchronous>, transform_indices = @transform_2, window_bounds = array<i64: 1, 32>}, {pipeline_mode = #tpu.pipeline_mode<synchronous>, transform_indices = @transform_3, window_bounds = array<i64: 1, 32>}, {transform_indices = @transform_4, window_bounds = array<i64: 1, 32, 96>}, {transform_indices = @transform_5, window_bounds = array<i64: 1, 1, 96>}, {transform_indices = @transform_6, window_bounds = array<i64: 1, 32, 32>}, {transform_indices = @transform_7, window_bounds = array<i64: 1, 1, 32>}, {transform_indices = @transform_8, window_bounds = array<i64: 1, 1, 32>}, {transform_indices = @transform_9, window_bounds = array<i64: 1, 1, 32>}, {transform_indices = @transform_10, window_bounds = array<i64: 1, 32, 64>}, {transform_indices = @transform_11, window_bounds = array<i64: 1, 1, 64>}, {transform_indices = @transform_12, window_bounds = array<i64: 1, 64, 32>}, {transform_indices = @transform_13, window_bounds = array<i64: 1, 1, 32>}, {transform_indices = @transform_14, window_bounds = array<i64: 1, 1, 32>}, {transform_indices = @transform_15, window_bounds = array<i64: 1, 1, 32>}, {pipeline_mode = #tpu.pipeline_mode<synchronous>, transform_indices = @transform_16, window_bounds = array<i64: 2, 32>}]} {
    %c0_i32 = arith.constant 0 : i32
    %0 = arith.cmpi eq, %arg0, %c0_i32 : i32
    %1 = arith.extui %0 : i1 to i32
    %c0_i32_0 = arith.constant 0 : i32
    %2 = arith.cmpi ne, %1, %c0_i32_0 : i32
    scf.if %2 {
      %c0_80 = arith.constant 0 : index
      %c0_81 = arith.constant 0 : index
      %177 = vector.load %arg1[%c0_80, %c0_81] : memref<16x32xf32, #tpu.memory_space<vmem>>, vector<16x32xf32>
      %c0_82 = arith.constant 0 : index
      %c0_83 = arith.constant 0 : index
      %178 = vector.load %arg3[%c0_82, %c0_83] : memref<1x32xf32, #tpu.memory_space<vmem>>, vector<1x32xf32>
      %c0_84 = arith.constant 0 : index
      %c0_85 = arith.constant 0 : index
      %179 = vector.load %arg4[%c0_84, %c0_85] : memref<1x32xf32, #tpu.memory_space<vmem>>, vector<1x32xf32>
      %cst_86 = arith.constant dense<0.000000e+00> : vector<16xf32>
      %180 = vector.multi_reduction <add>, %177, %cst_86 [1] : vector<16x32xf32> to vector<16xf32>
      %181 = vector.shape_cast %180 : vector<16xf32> to vector<16x1xf32>
      %cst_87 = arith.constant 3.200000e+01 : f32
      %182 = vector.broadcast %cst_87 : f32 to vector<16x1xf32>
      %183 = arith.divf %181, %182 : vector<16x1xf32>
      %184 = vector.broadcast %183 : vector<16x1xf32> to vector<16x32xf32>
      %185 = arith.subf %177, %184 : vector<16x32xf32>
      %186 = arith.mulf %185, %185 : vector<16x32xf32>
      %cst_88 = arith.constant dense<0.000000e+00> : vector<16xf32>
      %187 = vector.multi_reduction <add>, %186, %cst_88 [1] : vector<16x32xf32> to vector<16xf32>
      %188 = vector.shape_cast %187 : vector<16xf32> to vector<16x1xf32>
      %cst_89 = arith.constant 3.200000e+01 : f32
      %189 = vector.broadcast %cst_89 : f32 to vector<16x1xf32>
      %190 = arith.divf %188, %189 : vector<16x1xf32>
      %191 = vector.broadcast %183 : vector<16x1xf32> to vector<16x32xf32>
      %192 = arith.subf %177, %191 : vector<16x32xf32>
      %cst_90 = arith.constant 9.99999996E-13 : f32
      %193 = vector.broadcast %cst_90 : f32 to vector<16x1xf32>
      %194 = arith.addf %190, %193 : vector<16x1xf32>
      %195 = math.rsqrt %194 : vector<16x1xf32>
      %196 = vector.broadcast %195 : vector<16x1xf32> to vector<16x32xf32>
      %197 = arith.mulf %192, %196 : vector<16x32xf32>
      %198 = vector.broadcast %178 : vector<1x32xf32> to vector<16x32xf32>
      %199 = arith.mulf %197, %198 : vector<16x32xf32>
      %200 = vector.broadcast %179 : vector<1x32xf32> to vector<16x32xf32>
      %201 = arith.addf %199, %200 : vector<16x32xf32>
      %c0_91 = arith.constant 0 : index
      %c0_92 = arith.constant 0 : index
      %202 = vector.load %arg18[%c0_91, %c0_92] : memref<16x32xf32, #tpu.memory_space<vmem>>, vector<16x32xf32>
      tpu.vector_store %arg18[%c0_91, %c0_92], %201 {strides = array<i32>} : memref<16x32xf32, #tpu.memory_space<vmem>>, vector<16x32xf32>,
    } else {
    }
    %c0 = arith.constant 0 : index
    %c0_1 = arith.constant 0 : index
    %3 = vector.load %arg18[%c0, %c0_1] : memref<16x32xf32, #tpu.memory_space<vmem>>, vector<16x32xf32>
    %c0_2 = arith.constant 0 : index
    %c0_3 = arith.constant 0 : index
    %c0_4 = arith.constant 0 : index
    %4 = vector.load %arg5[%c0_2, %c0_3, %c0_4] : memref<1x32x96xf32, #tpu.memory_space<vmem>>, vector<1x32x96xf32>
    %5 = vector.shape_cast %4 : vector<1x32x96xf32> to vector<32x96xf32>
    %cst = arith.constant dense<0.000000e+00> : vector<16x96xf32>
    %6 = tpu.matmul %3, %5, %cst {dimension_numbers = #tpu.dot_dimension_numbers<[1], [0], [0], [1], [0, 0, 1, 1], [], []>} : vector<16x32xf32>, vector<32x96xf32>, vector<16x96xf32> -> vector<16x96xf32>
    %c0_5 = arith.constant 0 : index
    %c0_6 = arith.constant 0 : index
    %c0_7 = arith.constant 0 : index
    %7 = vector.load %arg6[%c0_5, %c0_6, %c0_7] : memref<1x1x96xf32, #tpu.memory_space<vmem>>, vector<1x1x96xf32>
    %8 = vector.shape_cast %7 : vector<1x1x96xf32> to vector<1x96xf32>
    %9 = vector.broadcast %8 : vector<1x96xf32> to vector<16x96xf32>
    %10 = arith.addf %6, %9 : vector<16x96xf32>
    %c0_8 = arith.constant 0 : index
    %c0_9 = arith.constant 0 : index
    %11 = vector.load %arg2[%c0_8, %c0_9] : memref<16x16xf32, #tpu.memory_space<vmem>>, vector<16x16xf32>
    %12 = vector.extract_strided_slice %10 {offsets = [0, 0], sizes = [16, 8], strides = [1, 1]} : vector<16x96xf32> to vector<16x8xf32>
    %13 = vector.extract_strided_slice %10 {offsets = [0, 32], sizes = [16, 8], strides = [1, 1]} : vector<16x96xf32> to vector<16x8xf32>
    %14 = vector.extract_strided_slice %10 {offsets = [0, 64], sizes = [16, 8], strides = [1, 1]} : vector<16x96xf32> to vector<16x8xf32>
    %cst_10 = arith.constant dense<0.000000e+00> : vector<16x16xf32>
    %15 = tpu.matmul %12, %13, %cst_10 {dimension_numbers = #tpu.dot_dimension_numbers<[1], [1], [0], [0], [0, 0, 1, 0], [], []>} : vector<16x8xf32>, vector<16x8xf32>, vector<16x16xf32> -> vector<16x16xf32>
    %cst_11 = arith.constant 0.353553385 : f32
    %16 = vector.broadcast %cst_11 : f32 to vector<16x16xf32>
    %17 = arith.mulf %15, %16 : vector<16x16xf32>
    %18 = arith.addf %17, %11 : vector<16x16xf32>
    %cst_12 = arith.constant dense<0xFF800000> : vector<16xf32>
    %19 = vector.multi_reduction <maximumf>, %18, %cst_12 [1] : vector<16x16xf32> to vector<16xf32>
    %20 = vector.shape_cast %19 : vector<16xf32> to vector<16x1xf32>
    %21 = vector.broadcast %20 : vector<16x1xf32> to vector<16x16xf32>
    %22 = arith.subf %18, %21 : vector<16x16xf32>
    %23 = math.exp %22 : vector<16x16xf32>
    %cst_13 = arith.constant dense<0.000000e+00> : vector<16xf32>
    %24 = vector.multi_reduction <add>, %23, %cst_13 [1] : vector<16x16xf32> to vector<16xf32>
    %25 = vector.shape_cast %24 : vector<16xf32> to vector<16x1xf32>
    %26 = tpu.reciprocal %25 {approx = true} : vector<16x1xf32> -> vector<16x1xf32>
    %27 = vector.broadcast %26 : vector<16x1xf32> to vector<16x16xf32>
    %28 = arith.mulf %23, %27 : vector<16x16xf32>
    %cst_14 = arith.constant dense<0.000000e+00> : vector<16x8xf32>
    %29 = tpu.matmul %28, %14, %cst_14 {dimension_numbers = #tpu.dot_dimension_numbers<[1], [0], [0], [1], [0, 0, 1, 1], [], []>} : vector<16x16xf32>, vector<16x8xf32>, vector<16x8xf32> -> vector<16x8xf32>
    %30 = vector.extract_strided_slice %10 {offsets = [0, 8], sizes = [16, 8], strides = [1, 1]} : vector<16x96xf32> to vector<16x8xf32>
    %31 = vector.extract_strided_slice %10 {offsets = [0, 40], sizes = [16, 8], strides = [1, 1]} : vector<16x96xf32> to vector<16x8xf32>
    %32 = vector.extract_strided_slice %10 {offsets = [0, 72], sizes = [16, 8], strides = [1, 1]} : vector<16x96xf32> to vector<16x8xf32>
    %cst_15 = arith.constant dense<0.000000e+00> : vector<16x16xf32>
    %33 = tpu.matmul %30, %31, %cst_15 {dimension_numbers = #tpu.dot_dimension_numbers<[1], [1], [0], [0], [0, 0, 1, 0], [], []>} : vector<16x8xf32>, vector<16x8xf32>, vector<16x16xf32> -> vector<16x16xf32>
    %cst_16 = arith.constant 0.353553385 : f32
    %34 = vector.broadcast %cst_16 : f32 to vector<16x16xf32>
    %35 = arith.mulf %33, %34 : vector<16x16xf32>
    %36 = arith.addf %35, %11 : vector<16x16xf32>
    %cst_17 = arith.constant dense<0xFF800000> : vector<16xf32>
    %37 = vector.multi_reduction <maximumf>, %36, %cst_17 [1] : vector<16x16xf32> to vector<16xf32>
    %38 = vector.shape_cast %37 : vector<16xf32> to vector<16x1xf32>
    %39 = vector.broadcast %38 : vector<16x1xf32> to vector<16x16xf32>
    %40 = arith.subf %36, %39 : vector<16x16xf32>
    %41 = math.exp %40 : vector<16x16xf32>
    %cst_18 = arith.constant dense<0.000000e+00> : vector<16xf32>
    %42 = vector.multi_reduction <add>, %41, %cst_18 [1] : vector<16x16xf32> to vector<16xf32>
    %43 = vector.shape_cast %42 : vector<16xf32> to vector<16x1xf32>
    %44 = tpu.reciprocal %43 {approx = true} : vector<16x1xf32> -> vector<16x1xf32>
    %45 = vector.broadcast %44 : vector<16x1xf32> to vector<16x16xf32>
    %46 = arith.mulf %41, %45 : vector<16x16xf32>
    %cst_19 = arith.constant dense<0.000000e+00> : vector<16x8xf32>
    %47 = tpu.matmul %46, %32, %cst_19 {dimension_numbers = #tpu.dot_dimension_numbers<[1], [0], [0], [1], [0, 0, 1, 1], [], []>} : vector<16x16xf32>, vector<16x8xf32>, vector<16x8xf32> -> vector<16x8xf32>
    %48 = vector.extract_strided_slice %10 {offsets = [0, 16], sizes = [16, 8], strides = [1, 1]} : vector<16x96xf32> to vector<16x8xf32>
    %49 = vector.extract_strided_slice %10 {offsets = [0, 48], sizes = [16, 8], strides = [1, 1]} : vector<16x96xf32> to vector<16x8xf32>
    %50 = vector.extract_strided_slice %10 {offsets = [0, 80], sizes = [16, 8], strides = [1, 1]} : vector<16x96xf32> to vector<16x8xf32>
    %cst_20 = arith.constant dense<0.000000e+00> : vector<16x16xf32>
    %51 = tpu.matmul %48, %49, %cst_20 {dimension_numbers = #tpu.dot_dimension_numbers<[1], [1], [0], [0], [0, 0, 1, 0], [], []>} : vector<16x8xf32>, vector<16x8xf32>, vector<16x16xf32> -> vector<16x16xf32>
    %cst_21 = arith.constant 0.353553385 : f32
    %52 = vector.broadcast %cst_21 : f32 to vector<16x16xf32>
    %53 = arith.mulf %51, %52 : vector<16x16xf32>
    %54 = arith.addf %53, %11 : vector<16x16xf32>
    %cst_22 = arith.constant dense<0xFF800000> : vector<16xf32>
    %55 = vector.multi_reduction <maximumf>, %54, %cst_22 [1] : vector<16x16xf32> to vector<16xf32>
    %56 = vector.shape_cast %55 : vector<16xf32> to vector<16x1xf32>
    %57 = vector.broadcast %56 : vector<16x1xf32> to vector<16x16xf32>
    %58 = arith.subf %54, %57 : vector<16x16xf32>
    %59 = math.exp %58 : vector<16x16xf32>
    %cst_23 = arith.constant dense<0.000000e+00> : vector<16xf32>
    %60 = vector.multi_reduction <add>, %59, %cst_23 [1] : vector<16x16xf32> to vector<16xf32>
    %61 = vector.shape_cast %60 : vector<16xf32> to vector<16x1xf32>
    %62 = tpu.reciprocal %61 {approx = true} : vector<16x1xf32> -> vector<16x1xf32>
    %63 = vector.broadcast %62 : vector<16x1xf32> to vector<16x16xf32>
    %64 = arith.mulf %59, %63 : vector<16x16xf32>
    %cst_24 = arith.constant dense<0.000000e+00> : vector<16x8xf32>
    %65 = tpu.matmul %64, %50, %cst_24 {dimension_numbers = #tpu.dot_dimension_numbers<[1], [0], [0], [1], [0, 0, 1, 1], [], []>} : vector<16x16xf32>, vector<16x8xf32>, vector<16x8xf32> -> vector<16x8xf32>
    %66 = vector.extract_strided_slice %10 {offsets = [0, 24], sizes = [16, 8], strides = [1, 1]} : vector<16x96xf32> to vector<16x8xf32>
    %67 = vector.extract_strided_slice %10 {offsets = [0, 56], sizes = [16, 8], strides = [1, 1]} : vector<16x96xf32> to vector<16x8xf32>
    %68 = vector.extract_strided_slice %10 {offsets = [0, 88], sizes = [16, 8], strides = [1, 1]} : vector<16x96xf32> to vector<16x8xf32>
    %cst_25 = arith.constant dense<0.000000e+00> : vector<16x16xf32>
    %69 = tpu.matmul %66, %67, %cst_25 {dimension_numbers = #tpu.dot_dimension_numbers<[1], [1], [0], [0], [0, 0, 1, 0], [], []>} : vector<16x8xf32>, vector<16x8xf32>, vector<16x16xf32> -> vector<16x16xf32>
    %cst_26 = arith.constant 0.353553385 : f32
    %70 = vector.broadcast %cst_26 : f32 to vector<16x16xf32>
    %71 = arith.mulf %69, %70 : vector<16x16xf32>
    %72 = arith.addf %71, %11 : vector<16x16xf32>
    %cst_27 = arith.constant dense<0xFF800000> : vector<16xf32>
    %73 = vector.multi_reduction <maximumf>, %72, %cst_27 [1] : vector<16x16xf32> to vector<16xf32>
    %74 = vector.shape_cast %73 : vector<16xf32> to vector<16x1xf32>
    %75 = vector.broadcast %74 : vector<16x1xf32> to vector<16x16xf32>
    %76 = arith.subf %72, %75 : vector<16x16xf32>
    %77 = math.exp %76 : vector<16x16xf32>
    %cst_28 = arith.constant dense<0.000000e+00> : vector<16xf32>
    %78 = vector.multi_reduction <add>, %77, %cst_28 [1] : vector<16x16xf32> to vector<16xf32>
    %79 = vector.shape_cast %78 : vector<16xf32> to vector<16x1xf32>
    %80 = tpu.reciprocal %79 {approx = true} : vector<16x1xf32> -> vector<16x1xf32>
    %81 = vector.broadcast %80 : vector<16x1xf32> to vector<16x16xf32>
    %82 = arith.mulf %77, %81 : vector<16x16xf32>
    %cst_29 = arith.constant dense<0.000000e+00> : vector<16x8xf32>
    %83 = tpu.matmul %82, %68, %cst_29 {dimension_numbers = #tpu.dot_dimension_numbers<[1], [0], [0], [1], [0, 0, 1, 1], [], []>} : vector<16x16xf32>, vector<16x8xf32>, vector<16x8xf32> -> vector<16x8xf32>
    %84 = tpu.concatenate %29, %47, %65, %83 in 1 : vector<16x8xf32>, vector<16x8xf32>, vector<16x8xf32>, vector<16x8xf32> -> vector<16x32xf32>
    %c0_30 = arith.constant 0 : index
    %c0_31 = arith.constant 0 : index
    %c0_32 = arith.constant 0 : index
    %85 = vector.load %arg7[%c0_30, %c0_31, %c0_32] : memref<1x32x32xf32, #tpu.memory_space<vmem>>, vector<1x32x32xf32>
    %86 = vector.shape_cast %85 : vector<1x32x32xf32> to vector<32x32xf32>
    %cst_33 = arith.constant dense<0.000000e+00> : vector<16x32xf32>
    %87 = tpu.matmul %84, %86, %cst_33 {dimension_numbers = #tpu.dot_dimension_numbers<[1], [0], [0], [1], [0, 0, 1, 1], [], []>} : vector<16x32xf32>, vector<32x32xf32>, vector<16x32xf32> -> vector<16x32xf32>
    %c0_34 = arith.constant 0 : index
    %c0_35 = arith.constant 0 : index
    %c0_36 = arith.constant 0 : index
    %88 = vector.load %arg8[%c0_34, %c0_35, %c0_36] : memref<1x1x32xf32, #tpu.memory_space<vmem>>, vector<1x1x32xf32>
    %89 = vector.shape_cast %88 : vector<1x1x32xf32> to vector<1x32xf32>
    %90 = vector.broadcast %89 : vector<1x32xf32> to vector<16x32xf32>
    %91 = arith.addf %87, %90 : vector<16x32xf32>
    %92 = arith.addf %91, %3 : vector<16x32xf32>
    %c0_37 = arith.constant 0 : index
    %c0_38 = arith.constant 0 : index
    %c0_39 = arith.constant 0 : index
    %93 = vector.load %arg9[%c0_37, %c0_38, %c0_39] : memref<1x1x32xf32, #tpu.memory_space<vmem>>, vector<1x1x32xf32>
    %94 = vector.shape_cast %93 : vector<1x1x32xf32> to vector<1x32xf32>
    %c0_40 = arith.constant 0 : index
    %c0_41 = arith.constant 0 : index
    %c0_42 = arith.constant 0 : index
    %95 = vector.load %arg10[%c0_40, %c0_41, %c0_42] : memref<1x1x32xf32, #tpu.memory_space<vmem>>, vector<1x1x32xf32>
    %96 = vector.shape_cast %95 : vector<1x1x32xf32> to vector<1x32xf32>
    %cst_43 = arith.constant dense<0.000000e+00> : vector<16xf32>
    %97 = vector.multi_reduction <add>, %92, %cst_43 [1] : vector<16x32xf32> to vector<16xf32>
    %98 = vector.shape_cast %97 : vector<16xf32> to vector<16x1xf32>
    %cst_44 = arith.constant 3.200000e+01 : f32
    %99 = vector.broadcast %cst_44 : f32 to vector<16x1xf32>
    %100 = arith.divf %98, %99 : vector<16x1xf32>
    %101 = vector.broadcast %100 : vector<16x1xf32> to vector<16x32xf32>
    %102 = arith.subf %92, %101 : vector<16x32xf32>
    %103 = arith.mulf %102, %102 : vector<16x32xf32>
    %cst_45 = arith.constant dense<0.000000e+00> : vector<16xf32>
    %104 = vector.multi_reduction <add>, %103, %cst_45 [1] : vector<16x32xf32> to vector<16xf32>
    %105 = vector.shape_cast %104 : vector<16xf32> to vector<16x1xf32>
    %cst_46 = arith.constant 3.200000e+01 : f32
    %106 = vector.broadcast %cst_46 : f32 to vector<16x1xf32>
    %107 = arith.divf %105, %106 : vector<16x1xf32>
    %108 = vector.broadcast %100 : vector<16x1xf32> to vector<16x32xf32>
    %109 = arith.subf %92, %108 : vector<16x32xf32>
    %cst_47 = arith.constant 9.99999996E-13 : f32
    %110 = vector.broadcast %cst_47 : f32 to vector<16x1xf32>
    %111 = arith.addf %107, %110 : vector<16x1xf32>
    %112 = math.rsqrt %111 : vector<16x1xf32>
    %113 = vector.broadcast %112 : vector<16x1xf32> to vector<16x32xf32>
    %114 = arith.mulf %109, %113 : vector<16x32xf32>
    %115 = vector.broadcast %94 : vector<1x32xf32> to vector<16x32xf32>
    %116 = arith.mulf %114, %115 : vector<16x32xf32>
    %117 = vector.broadcast %96 : vector<1x32xf32> to vector<16x32xf32>
    %118 = arith.addf %116, %117 : vector<16x32xf32>
    %c0_48 = arith.constant 0 : index
    %c0_49 = arith.constant 0 : index
    %c0_50 = arith.constant 0 : index
    %119 = vector.load %arg11[%c0_48, %c0_49, %c0_50] : memref<1x32x64xf32, #tpu.memory_space<vmem>>, vector<1x32x64xf32>
    %120 = vector.shape_cast %119 : vector<1x32x64xf32> to vector<32x64xf32>
    %cst_51 = arith.constant dense<0.000000e+00> : vector<16x64xf32>
    %121 = tpu.matmul %118, %120, %cst_51 {dimension_numbers = #tpu.dot_dimension_numbers<[1], [0], [0], [1], [0, 0, 1, 1], [], []>} : vector<16x32xf32>, vector<32x64xf32>, vector<16x64xf32> -> vector<16x64xf32>
    %c0_52 = arith.constant 0 : index
    %c0_53 = arith.constant 0 : index
    %c0_54 = arith.constant 0 : index
    %122 = vector.load %arg12[%c0_52, %c0_53, %c0_54] : memref<1x1x64xf32, #tpu.memory_space<vmem>>, vector<1x1x64xf32>
    %123 = vector.shape_cast %122 : vector<1x1x64xf32> to vector<1x64xf32>
    %124 = vector.broadcast %123 : vector<1x64xf32> to vector<16x64xf32>
    %125 = arith.addf %121, %124 : vector<16x64xf32>
    %cst_55 = arith.constant 5.000000e-01 : f32
    %126 = vector.broadcast %cst_55 : f32 to vector<16x64xf32>
    %127 = arith.mulf %126, %125 : vector<16x64xf32>
    %cst_56 = arith.constant 4.471500e-02 : f32
    %128 = vector.broadcast %cst_56 : f32 to vector<16x64xf32>
    %129 = arith.mulf %128, %125 : vector<16x64xf32>
    %130 = arith.mulf %129, %125 : vector<16x64xf32>
    %131 = arith.mulf %130, %125 : vector<16x64xf32>
    %132 = arith.addf %125, %131 : vector<16x64xf32>
    %cst_57 = arith.constant 0.797884583 : f32
    %133 = vector.broadcast %cst_57 : f32 to vector<16x64xf32>
    %134 = arith.mulf %133, %132 : vector<16x64xf32>
    %135 = math.tanh %134 : vector<16x64xf32>
    %cst_58 = arith.constant 1.000000e+00 : f32
    %136 = vector.broadcast %cst_58 : f32 to vector<16x64xf32>
    %137 = arith.addf %136, %135 : vector<16x64xf32>
    %138 = arith.mulf %127, %137 : vector<16x64xf32>
    %c0_59 = arith.constant 0 : index
    %c0_60 = arith.constant 0 : index
    %c0_61 = arith.constant 0 : index
    %139 = vector.load %arg13[%c0_59, %c0_60, %c0_61] : memref<1x64x32xf32, #tpu.memory_space<vmem>>, vector<1x64x32xf32>
    %140 = vector.shape_cast %139 : vector<1x64x32xf32> to vector<64x32xf32>
    %cst_62 = arith.constant dense<0.000000e+00> : vector<16x32xf32>
    %141 = tpu.matmul %138, %140, %cst_62 {dimension_numbers = #tpu.dot_dimension_numbers<[1], [0], [0], [1], [0, 0, 1, 1], [], []>} : vector<16x64xf32>, vector<64x32xf32>, vector<16x32xf32> -> vector<16x32xf32>
    %c0_63 = arith.constant 0 : index
    %c0_64 = arith.constant 0 : index
    %c0_65 = arith.constant 0 : index
    %142 = vector.load %arg14[%c0_63, %c0_64, %c0_65] : memref<1x1x32xf32, #tpu.memory_space<vmem>>, vector<1x1x32xf32>
    %143 = vector.shape_cast %142 : vector<1x1x32xf32> to vector<1x32xf32>
    %144 = vector.broadcast %143 : vector<1x32xf32> to vector<16x32xf32>
    %145 = arith.addf %141, %144 : vector<16x32xf32>
    %146 = arith.addf %145, %118 : vector<16x32xf32>
    %c0_66 = arith.constant 0 : index
    %c0_67 = arith.constant 0 : index
    %c0_68 = arith.constant 0 : index
    %147 = vector.load %arg15[%c0_66, %c0_67, %c0_68] : memref<1x1x32xf32, #tpu.memory_space<vmem>>, vector<1x1x32xf32>
    %148 = vector.shape_cast %147 : vector<1x1x32xf32> to vector<1x32xf32>
    %c0_69 = arith.constant 0 : index
    %c0_70 = arith.constant 0 : index
    %c0_71 = arith.constant 0 : index
    %149 = vector.load %arg16[%c0_69, %c0_70, %c0_71] : memref<1x1x32xf32, #tpu.memory_space<vmem>>, vector<1x1x32xf32>
    %150 = vector.shape_cast %149 : vector<1x1x32xf32> to vector<1x32xf32>
    %cst_72 = arith.constant dense<0.000000e+00> : vector<16xf32>
    %151 = vector.multi_reduction <add>, %146, %cst_72 [1] : vector<16x32xf32> to vector<16xf32>
    %152 = vector.shape_cast %151 : vector<16xf32> to vector<16x1xf32>
    %cst_73 = arith.constant 3.200000e+01 : f32
    %153 = vector.broadcast %cst_73 : f32 to vector<16x1xf32>
    %154 = arith.divf %152, %153 : vector<16x1xf32>
    %155 = vector.broadcast %154 : vector<16x1xf32> to vector<16x32xf32>
    %156 = arith.subf %146, %155 : vector<16x32xf32>
    %157 = arith.mulf %156, %156 : vector<16x32xf32>
    %cst_74 = arith.constant dense<0.000000e+00> : vector<16xf32>
    %158 = vector.multi_reduction <add>, %157, %cst_74 [1] : vector<16x32xf32> to vector<16xf32>
    %159 = vector.shape_cast %158 : vector<16xf32> to vector<16x1xf32>
    %cst_75 = arith.constant 3.200000e+01 : f32
    %160 = vector.broadcast %cst_75 : f32 to vector<16x1xf32>
    %161 = arith.divf %159, %160 : vector<16x1xf32>
    %162 = vector.broadcast %154 : vector<16x1xf32> to vector<16x32xf32>
    %163 = arith.subf %146, %162 : vector<16x32xf32>
    %cst_76 = arith.constant 9.99999996E-13 : f32
    %164 = vector.broadcast %cst_76 : f32 to vector<16x1xf32>
    %165 = arith.addf %161, %164 : vector<16x1xf32>
    %166 = math.rsqrt %165 : vector<16x1xf32>
    %167 = vector.broadcast %166 : vector<16x1xf32> to vector<16x32xf32>
    %168 = arith.mulf %163, %167 : vector<16x32xf32>
    %169 = vector.broadcast %148 : vector<1x32xf32> to vector<16x32xf32>
    %170 = arith.mulf %168, %169 : vector<16x32xf32>
    %171 = vector.broadcast %150 : vector<1x32xf32> to vector<16x32xf32>
    %172 = arith.addf %170, %171 : vector<16x32xf32>
    %c0_77 = arith.constant 0 : index
    %c0_78 = arith.constant 0 : index
    %173 = vector.load %arg18[%c0_77, %c0_78] : memref<16x32xf32, #tpu.memory_space<vmem>>, vector<16x32xf32>
    tpu.vector_store %arg18[%c0_77, %c0_78], %172 {strides = array<i32>} : memref<16x32xf32, #tpu.memory_space<vmem>>, vector<16x32xf32>,
    %c1_i32 = arith.constant 1 : i32
    %174 = arith.cmpi eq, %arg0, %c1_i32 : i32
    %175 = arith.extui %174 : i1 to i32
    %c0_i32_79 = arith.constant 0 : i32
    %176 = arith.cmpi ne, %175, %c0_i32_79 : i32
    scf.if %176 {
      %177 = vector.extract_strided_slice %172 {offsets = [0, 0], sizes = [1, 32], strides = [1, 1]} : vector<16x32xf32> to vector<1x32xf32>
      %178 = vector.extract_strided_slice %172 {offsets = [8, 0], sizes = [1, 32], strides = [1, 1]} : vector<16x32xf32> to vector<1x32xf32>
      %179 = tpu.concatenate %177, %178 in 0 : vector<1x32xf32>, vector<1x32xf32> -> vector<2x32xf32>
      %180 = arith.mulf %179, %179 : vector<2x32xf32>
      %cst_80 = arith.constant dense<0.000000e+00> : vector<2xf32>
      %181 = vector.multi_reduction <add>, %180, %cst_80 [1] : vector<2x32xf32> to vector<2xf32>
      %182 = vector.shape_cast %181 : vector<2xf32> to vector<2x1xf32>
      %183 = math.sqrt %182 : vector<2x1xf32>
      %cst_81 = arith.constant 9.99999996E-13 : f32
      %184 = vector.broadcast %cst_81 : f32 to vector<2x1xf32>
      %185 = arith.maximumf %183, %184 : vector<2x1xf32>
      %186 = vector.broadcast %185 : vector<2x1xf32> to vector<2x32xf32>
      %187 = arith.divf %179, %186 : vector<2x32xf32>
      %c0_82 = arith.constant 0 : index
      %c0_83 = arith.constant 0 : index
      %188 = vector.load %arg17[%c0_82, %c0_83] : memref<2x32xf32, #tpu.memory_space<vmem>>, vector<2x32xf32>
      tpu.vector_store %arg17[%c0_82, %c0_83], %187 {strides = array<i32>} : memref<2x32xf32, #tpu.memory_space<vmem>>, vector<2x32xf32>,
    } else {
    }
    return
  }
  func.func @transform_0(%arg0: i32) -> (i32, i32) {
    %c0_i32 = arith.constant 0 : i32
    %c0_i32_0 = arith.constant 0 : i32
    %c0_i32_1 = arith.constant 0 : i32
    return %c0_i32, %c0_i32_0 : i32, i32
  }
  func.func @transform_1(%arg0: i32) -> (i32, i32) {
    %c0_i32 = arith.constant 0 : i32
    %c0_i32_0 = arith.constant 0 : i32
    %c0_i32_1 = arith.constant 0 : i32
    return %c0_i32, %c0_i32_0 : i32, i32
  }
  func.func @transform_2(%arg0: i32) -> (i32, i32) {
    %c0_i32 = arith.constant 0 : i32
    %c0_i32_0 = arith.constant 0 : i32
    %c0_i32_1 = arith.constant 0 : i32
    return %c0_i32, %c0_i32_0 : i32, i32
  }
  func.func @transform_3(%arg0: i32) -> (i32, i32) {
    %c0_i32 = arith.constant 0 : i32
    %c0_i32_0 = arith.constant 0 : i32
    %c0_i32_1 = arith.constant 0 : i32
    return %c0_i32, %c0_i32_0 : i32, i32
  }
  func.func @transform_4(%arg0: i32) -> (i32, i32, i32) {
    %c0_i32 = arith.constant 0 : i32
    %c0_i32_0 = arith.constant 0 : i32
    %c0_i32_1 = arith.constant 0 : i32
    return %arg0, %c0_i32, %c0_i32_0 : i32, i32, i32
  }
  func.func @transform_5(%arg0: i32) -> (i32, i32, i32) {
    %c0_i32 = arith.constant 0 : i32
    %c0_i32_0 = arith.constant 0 : i32
    %c0_i32_1 = arith.constant 0 : i32
    return %arg0, %c0_i32, %c0_i32_0 : i32, i32, i32
  }
  func.func @transform_6(%arg0: i32) -> (i32, i32, i32) {
    %c0_i32 = arith.constant 0 : i32
    %c0_i32_0 = arith.constant 0 : i32
    %c0_i32_1 = arith.constant 0 : i32
    return %arg0, %c0_i32, %c0_i32_0 : i32, i32, i32
  }
  func.func @transform_7(%arg0: i32) -> (i32, i32, i32) {
    %c0_i32 = arith.constant 0 : i32
    %c0_i32_0 = arith.constant 0 : i32
    %c0_i32_1 = arith.constant 0 : i32
    return %arg0, %c0_i32, %c0_i32_0 : i32, i32, i32
  }
  func.func @transform_8(%arg0: i32) -> (i32, i32, i32) {
    %c0_i32 = arith.constant 0 : i32
    %c0_i32_0 = arith.constant 0 : i32
    %c0_i32_1 = arith.constant 0 : i32
    return %arg0, %c0_i32, %c0_i32_0 : i32, i32, i32
  }
  func.func @transform_9(%arg0: i32) -> (i32, i32, i32) {
    %c0_i32 = arith.constant 0 : i32
    %c0_i32_0 = arith.constant 0 : i32
    %c0_i32_1 = arith.constant 0 : i32
    return %arg0, %c0_i32, %c0_i32_0 : i32, i32, i32
  }
  func.func @transform_10(%arg0: i32) -> (i32, i32, i32) {
    %c0_i32 = arith.constant 0 : i32
    %c0_i32_0 = arith.constant 0 : i32
    %c0_i32_1 = arith.constant 0 : i32
    return %arg0, %c0_i32, %c0_i32_0 : i32, i32, i32
  }
  func.func @transform_11(%arg0: i32) -> (i32, i32, i32) {
    %c0_i32 = arith.constant 0 : i32
    %c0_i32_0 = arith.constant 0 : i32
    %c0_i32_1 = arith.constant 0 : i32
    return %arg0, %c0_i32, %c0_i32_0 : i32, i32, i32
  }
  func.func @transform_12(%arg0: i32) -> (i32, i32, i32) {
    %c0_i32 = arith.constant 0 : i32
    %c0_i32_0 = arith.constant 0 : i32
    %c0_i32_1 = arith.constant 0 : i32
    return %arg0, %c0_i32, %c0_i32_0 : i32, i32, i32
  }
  func.func @transform_13(%arg0: i32) -> (i32, i32, i32) {
    %c0_i32 = arith.constant 0 : i32
    %c0_i32_0 = arith.constant 0 : i32
    %c0_i32_1 = arith.constant 0 : i32
    return %arg0, %c0_i32, %c0_i32_0 : i32, i32, i32
  }
  func.func @transform_14(%arg0: i32) -> (i32, i32, i32) {
    %c0_i32 = arith.constant 0 : i32
    %c0_i32_0 = arith.constant 0 : i32
    %c0_i32_1 = arith.constant 0 : i32
    return %arg0, %c0_i32, %c0_i32_0 : i32, i32, i32
  }
  func.func @transform_15(%arg0: i32) -> (i32, i32, i32) {
    %c0_i32 = arith.constant 0 : i32
    %c0_i32_0 = arith.constant 0 : i32
    %c0_i32_1 = arith.constant 0 : i32
    return %arg0, %c0_i32, %c0_i32_0 : i32, i32, i32
  }
  func.func @transform_16(%arg0: i32) -> (i32, i32) {
    %c0_i32 = arith.constant 0 : i32
    %c0_i32_0 = arith.constant 0 : i32
    %c0_i32_1 = arith.constant 0 : i32
    return %c0_i32, %c0_i32_0 : i32, i32
  }
}

</mosaic_0001>

<bundles_post_ra>
// kernel: mul.8
= control target key start
LH: loop header
LB: loop body
LE: loop exit
PB: predicated region body
PF: predicated region fallthrough
CT: control target
= control target key end

     0   :  { %vm7_vm0 = vcmask 64512   ;;  %vm13_vm1 = vcmask 130112   ;;  %s39_s0 = inlined_call_operand.vmem [shape: f32[2,8], index: 0, kind: input, shape index: {}]   ;;  %s40_s1 = inlined_call_operand.vmem [shape: f32[16], index: 1, kind: output, shape index: {}]  }
   0x1   :  { %v4_v0 = vld [vmem:[%s39_s0] sm:$0x3]  ;;  %s22_s0 = smov 8  }
   0x2   :  { %5 = vst [vmem:[#allocation1] sm:$0x3] %v4_v0 }
   0x9   :  { %v10_v1 = vld [vmem:[#allocation1 + $0x1] sm:$0x1]   ;;  %v6_v2 = vld [vmem:[#allocation1] sm:$0x1]  }
   0xa   :  { %11 = vrot.lane.b32.xlu0 %v10_v1, %s22_s0  ;;  %8 = vst.msk [vmem:[#allocation0] sm:$0x1] %vm7_vm0, %v6_v2  }
  0x7c   :  { %v12_v3 = vpop.permute.xlu0 %11  }
  0x7d   :  { %14 = vst.msk [vmem:[#allocation0] sm:$0x1] %vm13_vm1, %v12_v3  }
  0x84   :  { %v18_v4 = vld [vmem:[#allocation0] sm:$0x1] }
  0x85   :  { %20 = vst [vmem:[%s40_s1] sm:$0x1] %v18_v4 }

// kernel: embedding_model_forward.1
= control target key start
LH: loop header
LB: loop body
LE: loop exit
PB: predicated region body
PF: predicated region fallthrough
CT: control target
= control target key end

     0   :  { %s3134_s0 = inlined_call_operand.vmem [shape: f32[16,32], index: 0, kind: input, shape index: {}]   ;;  %s3135_s1 = inlined_call_operand.vmem [shape: f32[16,16], index: 1, kind: input, shape index: {}]   ;;  %s3136_s2 = inlined_call_operand.vmem [shape: f32[1,32], index: 2, kind: input, shape index: {}]   ;;  %s3137_s3 = inlined_call_operand.vmem [shape: f32[1,32], index: 3, kind: input, shape index: {}]   ;;  %s3138_s4 = inlined_call_operand.vmem [shape: f32[2,32,96], index: 4, kind: input, shape index: {}]   ;;  %s3139_s5 = inlined_call_operand.vmem [shape: f32[2,1,96], index: 5, kind: input, shape index: {}]   ;;  %s3140_s6 = inlined_call_operand.vmem [shape: f32[2,32,32], index: 6, kind: input, shape index: {}]   ;;  %s3141_s7 = inlined_call_operand.vmem [shape: f32[2,1,32], index: 7, kind: input, shape index: {}]   ;;  %s3142_s8 = inlined_call_operand.vmem [shape: f32[2,1,32], index: 8, kind: input, shape index: {}]   ;;  %s3143_s9 = inlined_call_operand.vmem [shape: f32[2,1,32], index: 9, kind: input, shape index: {}]   ;;  %s3144_s10 = inlined_call_operand.vmem [shape: f32[2,32,64], index: 10, kind: input, shape index: {}]   ;;  %s3145_s11 = inlined_call_operand.vmem [shape: f32[2,1,64], index: 11, kind: input, shape index: {}]   ;;  %s3146_s12 = inlined_call_operand.vmem [shape: f32[2,64,32], index: 12, kind: input, shape index: {}]   ;;  %s3147_s13 = inlined_call_operand.vmem [shape: f32[2,1,32], index: 13, kind: input, shape index: {}]   ;;  %s3148_s14 = inlined_call_operand.vmem [shape: f32[2,1,32], index: 14, kind: input, shape index: {}]   ;;  %s3149_s15 = inlined_call_operand.vmem [shape: f32[2,1,32], index: 15, kind: input, shape index: {}]   ;;  %s3150_s16 = inlined_call_operand.hbm [shape: f32[2,32], index: 16, kind: output, shape index: {}]  }
   0x1   :  { %3156 = sst [smem:[#allocation8_spill]] %s3134_s0 }
   0x2   :  { %3157 = sst [smem:[#allocation9_spill]] %s3135_s1 }
   0x3   :  { %3158 = sst [smem:[#allocation10_spill]] %s3137_s3 }
   0x4   :  { %3159 = sst [smem:[#allocation11_spill]] %s3138_s4 }
   0x5   :  { %3160 = sst [smem:[#allocation12_spill]] %s3140_s6 }
   0x6   :  { %3161 = sst [smem:[#allocation13_spill]] %s3150_s16 }
   0x7   :  { %21 = vsyncpa [#allocation4], 0  ;;  %s2822_s21 = smov 0  }
   0x8 LB: > { %3162 = sst [smem:[#allocation6_spill]] %s2720_s21  ;;  %s2828_s22 = sadd.s32 4294967295, %s2720_s21   ;;  %s2720_s21 = sphi %s2822_s21, %s27_s21  }
   0x9   : > { %p2254_p0 = scmp.ge.s32.totalorder %s2720_s21, 1  ;;  %p552_p1 = scmp.lt.s32.totalorder %s2720_s21, 3 }
   0xb   : > { %p553_p2 = pnand %p2254_p0, %p552_p1 }
   0xd   : > { %556 = sbr.rel (%p553_p2) target bundleno = 4215 (0x1077), region = 84 }
  0x14   : > { %p636_p3 = scmp.lt.s32.totalorder %s2828_s22, 1  ;;  %s3163_s4 = sld [smem:[#allocation11_spill]] }
  0x15   : > { %s3164_s6 = sld [smem:[#allocation12_spill]]  ;;  %p2263_p4 = scmp.ne.s32.totalorder %s2828_s22, 0 }
  0x16   : > { %s2834_s23 = scalar_select %p636_p3, %s2828_s22, 1 }
  0x17   : > { %683 = sbr.rel (%p2263_p4) target bundleno = 348 (0x15c), region = 88  ;;  %s3166_s19 = sld [smem:[#allocation8_spill]] (!%p2263_p4)  ;;  %vm688_vm0 = vcmask (!%p2263_p4), 261120   ;;  %v2264_v21 = vld [vmem:[%s3136_s2] ss:$0 sm:$0xff] (!%p2263_p4) }
  0x18   : > { %s2311_s24 = sshll.u32 %s2834_s23, 5  ;;  %s673_s25 = scalar_lea.vmem %s3147_s13, %s2834_s23 }
  0x19   : > { %s676_s28 = scalar_lea.vmem %s3148_s14, %s2834_s23  ;;  %s679_s3 = scalar_lea.vmem %s3149_s15, %s2834_s23 }
  0x1a   : > { %s2844_s30 = scalar_lea.vmem %s3163_s4, %s2311_s24  ;;  %s2866_s4 = scalar_lea.vmem %s3144_s10, %s2311_s24 }
  0x1b   : > { %s2849_s18 = scalar_lea.vmem %s3164_s6, %s2311_s24  ;;  %s665_s6 = scalar_lea.vmem %s3145_s11, %s2834_s23 }
  0x1c   : > { %3165 = sst [smem:[#allocation7_spill]] %s2849_s18  ;;  %s2314_s18 = sshll.u32 %s2834_s23, 6 }
  0x1d   : > { %s2876_s21 = scalar_lea.vmem %s3146_s12, %s2314_s18  ;;  %v684_v0 = vld [vmem:[%s3166_s19] sm:$0xff] (!%p2263_p4)  ;;  %v685_v1 = vld [vmem:[%s3166_s19 + $0x8] sm:$0xff] (!%p2263_p4)  ;;  %s3167_s24 = sld [smem:[#allocation10_spill]] (!%p2263_p4) }
  0x1e   : > { %v689_v2 = vsel %vm688_vm0, %v684_v0, 0.0  ;;  %v692_v3 = vsel %vm688_vm0, %v685_v1, 0.0 }
  0x1f   : > { %690 = vadd.xlane.f32.xlu0 %v689_v2 }
  0x23   : > { %693 = vadd.xlane.f32.xlu0 %v692_v3  ;;  %v2265_v23 = vld [vmem:[%s3167_s24] ss:$0 sm:$0xff] }
  0xac   : > { %v691_v4 = vpop.xlane.xlu0 %690 }
  0xad   : > { %v696_v5 = vmul.f32 0.03125, %v691_v4 }
  0xaf   : > { %v698_v6 = vsub.f32 %v684_v0, %v696_v5 }
  0xb0   : > { %v694_v7 = vpop.xlane.xlu0 %693 }
  0xb1   : > { %v697_v8 = vmul.f32 0.03125, %v694_v7  ;;  %v700_v9 = vmul.f32 %v698_v6, %v698_v6 }
  0xb3   : > { %v699_v10 = vsub.f32 %v685_v1, %v697_v8  ;;  %v702_v11 = vsel %vm688_vm0, %v700_v9, 0.0 }
  0xb4   : > { %703 = vadd.xlane.f32.xlu1 %v702_v11 }
  0xb5   : > { %v701_v12 = vmul.f32 %v699_v10, %v699_v10 }
  0xb7   : > { %v705_v13 = vsel %vm688_vm0, %v701_v12, 0.0 }
  0xb8   : > { %706 = vadd.xlane.f32.xlu1 %v705_v13 }
 0x141   : > { %v704_v14 = vpop.xlane.xlu1 %703 }
 0x142   : > { %v708_v15 = vmul.f32 0.03125, %v704_v14 }
 0x144   : > { %v710_v16 = vadd.f32 1e-12, %v708_v15 }
 0x145   : > { %v707_v17 = vpop.xlane.xlu1 %706 }
 0x146   : > { %2592 = vrsqrt.f32 %v710_v16  ;;  %v709_v18 = vmul.f32 0.03125, %v707_v17 }
 0x148   : > { %v711_v19 = vadd.f32 1e-12, %v709_v18 }
 0x14a   : > { %2594 = vrsqrt.f32 %v711_v19 }
 0x150   : > { %v2593_v20 = vpop.eup %2592 }
 0x151   : > { %v714_v22 = vmul.f32 %v2593_v20, %v698_v6 }
 0x153   : > { %v722_v24 = vmul.f32 %v2264_v21, %v714_v22 }
 0x154   : > { %v2595_v25 = vpop.eup %2594 }
 0x155   : > { %v730_v26 = vadd.f32 %v2265_v23, %v722_v24  ;;  %v715_v27 = vmul.f32 %v2595_v25, %v699_v10 }
 0x157   : > { %732 = vst.msk [vmem:[#allocation2] sm:$0xff] %vm688_vm0, %v730_v26  ;;  %v723_v28 = vmul.f32 %v2264_v21, %v715_v27 }
 0x159   : > { %v731_v29 = vadd.f32 %v2265_v23, %v723_v28 }
 0x15b   : > { %733 = vst.msk [vmem:[#allocation2 + $0x8] sm:$0xff] %vm688_vm0, %v731_v29 }
 0x15c PF: > { %v736_v30 = vld [vmem:[%s2844_s30] sm:$0xff]  ;;  %v737_v31 = vld [vmem:[%s2844_s30 + $0x8] sm:$0xff]  ;;  %v738_v32 = vld [vmem:[%s2844_s30 + $0x10] sm:$0xff]  ;;  %vm747_vm1 = vcmask 261120   ;;  %s3168_s17 = scalar_lea.vmem %s3139_s5, %s2834_s23  ;;  %vm837_vm2 = vcmask 64512   ;;  %s2723_s18 = smov 96  }
 0x15d   : > { %v2483_v33 = vpack.c.bf16 %v737_v31, %v736_v30  ;;  %v739_v34 = vld [vmem:[%s2844_s30 + $0x18] sm:$0xff]  ;;  %v2266_v38 = vld [vmem:[%s3168_s17] ss:$0 sm:$0xff]  ;;  %s2722_s30 = smov 120   ;;  %s2724_s20 = smov 88   ;;  %vm2942_vm3 = vmpackc.low %vm837_vm2, %vm837_vm2  ;;  %vm925_vm4 = vcmask 130048  }
 0x15e   : > { %v2913_v35 = vld [vmem:[#allocation2] sm:$0xff]  ;;  %v2487_v36 = vpack.c.bf16 %v739_v34, %v738_v32  ;;  %s3171_s16 = sld [smem:[#allocation9_spill]]  ;;  %s2725_s29 = smov 64   ;;  %vm1675_vm5 = vcmask 195584   ;;  %vm1942_vm6 = vcmask 523264  }
 0x15f   : > { %2383 = vmatprep.mubr.msk.f32.mxu1 %vm747_vm1, %v2913_v35  ;;  %2484 = vmatprep.subr.bf16.mxu1 %v2483_v33  ;;  %s2726_s0 = smov 80   ;;  %s2727_s17 = smov 56  }
 0x160   : > { %2486 = vmatpush3.bf16.msra.mxu1 %v2483_v33  ;;  %s2731_s27 = smov 48   ;;  %s2732_s1 = smov 8  }
 0x161   : > { %2488 = vmatprep.subr.bf16.mxu1 %v2487_v36  ;;  %s2733_s26 = smov 40   ;;  %s2734_s24 = smov 16  }
 0x162   : > { %v2917_v37 = vld [vmem:[#allocation2 + $0x8] sm:$0xff]  ;;  %p2306_p5 = scmp.ne.s32.totalorder %s2828_s22, 1 }
 0x163   : > { %vm2079_vm7 = vcmask (!%p2306_p5), 1040384   ;;  %vm2082_vm8 = vcmask (!%p2306_p5), 254976  }
 0x164   : > { %2490 = vmatpush3.bf16.msra.mxu1 %v2487_v36  ;;  %v2961_v56 = vld [vmem:[%s3171_s16 + $0x8] sm:$0xff]  ;;  %v2966_v59 = vld [vmem:[%s3171_s16] sm:$0xff] }
 0x167   : > { %2384 = vmatmul.mubr.msk.f32.vlgmr.msra.gmra.mrb[0].mxu1 %vm747_vm1, %v2917_v37 }
 0x23a   : > { %v2385_v39 = vpop.f32.mrb[0].mxu1 }
 0x23b   : > { %v2926_v40 = vadd.f32 %v2385_v39, %v2266_v38  ;;  %v820_v41 = vpop.f32.mrb[1].mxu1 }
 0x23c   : > { %v2928_v42 = vadd.f32 %v2266_v38, %v820_v41 }
 0x23e   : > { %1035 = vrot.lane.b32.xlu1 %v2928_v42, %s2722_s30  ;;  %2390 = vmatprep.mubr.msk.f32.mxu1 %vm837_vm2, %v2928_v42  ;;  %v2935_v43 = vpack.i.bf16 %v2926_v40, %v2928_v42 }
 0x240   : > { %2597 = vrot.lane.b32.xlu0 %v2935_v43, %s2723_s18  ;;  %s2729_s18 = smov 72  }
 0x242   : > { %1037 = vrot.lane.b32.xlu1 %v2926_v40, %s2722_s30  ;;  %s2728_s30 = smov 112  }
 0x244   : > { %2602 = vrot.lane.b32.xlu0 %v2935_v43, %s2724_s20  ;;  %s2730_s20 = smov 104  }
 0x2b0   : > { %v1036_v53 = vpop.permute.xlu1 %1035 }
 0x2b2   : > { %v2598_v44 = vpop.permute.xlu0 %2597 }
 0x2b3   : > { %v2600_v45 = vunpack.i.h.bf16 %v2598_v44  ;;  %v2599_v46 = vunpack.i.l.bf16 %v2598_v44 }
 0x2b4   : > { %v1038_v54 = vpop.permute.xlu1 %1037 }
 0x2b5   : > { %v2491_v48 = vpack.c.bf16 %v2600_v45, %v2599_v46 }
 0x2b6   : > { %v2603_v49 = vpop.permute.xlu0 %2602 }
 0x2b7   : > { %v2605_v50 = vunpack.i.h.bf16 %v2603_v49  ;;  %v2604_v51 = vunpack.i.l.bf16 %v2603_v49  ;;  %2493 = vmatprep.subr.msk.bf16.mxu1 %vm2942_vm3, %v2491_v48 }
 0x2b8   : > { %2496 = vmatpush3.bf16.xpose.msk.msra.mxu1 %vm2942_vm3, %v2491_v48 }
 0x2b9   : > { %v2501_v52 = vpack.c.bf16 %v2605_v50, %v2604_v51 }
 0x2bb   : > { %2503 = vmatprep.subr.msk.bf16.mxu1 %vm2942_vm3, %v2501_v52 }
 0x2bf   : > { %2391 = vmatmul.mubr.msk.f32.vlgmr.msra.gmra.mrb[2].mxu1 %vm837_vm2, %v2926_v40 }
 0x2c0   : > { %2506 = vmatpush3.bf16.xpose.msk.msra.mxu1 %vm2942_vm3, %v2501_v52  ;;  %2404 = vmatprep.mubr.msk.f32.mxu1 %vm837_vm2, %v1036_v53 }
 0x2c7   : > { %2405 = vmatmul.mubr.msk.f32.vlgmr.msra.gmra.mrb[4].mxu1 %vm837_vm2, %v1038_v54 }
 0x392   : > { %v2392_v55 = vpop.f32.mrb[2].mxu1 }
 0x393   : > { %v922_v57 = vmul.f32 0.35355338, %v2392_v55  ;;  %v912_v58 = vpop.f32.mrb[3].mxu1 }
 0x394   : > { %v921_v60 = vmul.f32 0.35355338, %v912_v58 }
 0x395   : > { %v924_v61 = vadd.f32 %v922_v57, %v2961_v56 }
 0x396   : > { %v923_v62 = vadd.f32 %v921_v60, %v2966_v59 }
 0x397   : > { %v929_v63 = vsel %vm925_vm4, %v924_v61, -inf }
 0x398   : > { %930 = vmax.xlane.f32.xlu1 %v929_v63  ;;  %v926_v0 = vsel %vm925_vm4, %v923_v62, -inf }
 0x399   : > { %927 = vmax.xlane.f32.xlu0 %v926_v0 }
 0x39a   : > { %v2406_v1 = vpop.f32.mrb[4].mxu1 }
 0x39b   : > { %v1117_v2 = vpop.f32.mrb[5].mxu1  ;;  %v1127_v3 = vmul.f32 0.35355338, %v2406_v1 }
 0x39c   : > { %v1126_v4 = vmul.f32 0.35355338, %v1117_v2 }
 0x39d   : > { %v1129_v7 = vadd.f32 %v1127_v3, %v2961_v56 }
 0x39e   : > { %v1128_v5 = vadd.f32 %v1126_v4, %v2966_v59 }
 0x39f   : > { %v1133_v8 = vsel %vm925_vm4, %v1129_v7, -inf }
 0x3a0   : > { %v1130_v6 = vsel %vm925_vm4, %v1128_v5, -inf }
 0x3a1   : > { %1131 = vmax.xlane.f32.xlu0 %v1130_v6 }
 0x3a5   : > { %1134 = vmax.xlane.f32.xlu0 %v1133_v8 }
 0x3a9   : > { %2607 = vrot.lane.b32.xlu1 %v2935_v43, %s2725_s29  ;;  %s3172_s29 = sld [smem:[#allocation7_spill]] }
 0x425   : > { %v931_v9 = vpop.xlane.xlu1 %930 }
 0x426   : > { %v933_v10 = vsub.f32 %v924_v61, %v931_v9  ;;  %v928_v11 = vpop.xlane.xlu0 %927 }
 0x427   : > { %v932_v12 = vsub.f32 %v923_v62, %v928_v11 }
 0x428   : > { %v936_v13 = vmul.f32 1.442695, %v933_v10 }
 0x429   : > { %v934_v14 = vmul.f32 1.442695, %v932_v12  ;;  %v2608_v15 = vpop.permute.xlu1 %2607 }
 0x42a   : > { %2636 = vpow2.f32 %v936_v13  ;;  %v2610_v16 = vunpack.i.h.bf16 %v2608_v15  ;;  %v2609_v17 = vunpack.i.l.bf16 %v2608_v15 }
 0x42b   : > { %2638 = vpow2.f32 %v934_v14 }
 0x42c   : > { %v2497_v18 = vpack.c.bf16 %v2610_v16, %v2609_v17 }
 0x42e   : > { %2498 = vmatprep.subr.bf16.mxu0 %v2497_v18  ;;  %v1132_v19 = vpop.xlane.xlu0 %1131 }
 0x42f   : > { %2500 = vmatpush3.bf16.msra.mxu0 %v2497_v18  ;;  %v1136_v29 = vsub.f32 %v1128_v5, %v1132_v19 }
 0x431   : > { %v1138_v30 = vmul.f32 1.442695, %v1136_v29 }
 0x432   : > { %v1135_v20 = vpop.xlane.xlu0 %1134 }
 0x433   : > { %v1137_v21 = vsub.f32 %v1129_v7, %v1135_v20 }
 0x434   : > { %v2637_v22 = vpop.eup %2636 }
 0x435   : > { %v2639_v23 = vpop.eup %2638  ;;  %v1140_v24 = vmul.f32 1.442695, %v1137_v21  ;;  %v941_v25 = vsel %vm925_vm4, %v2637_v22, 0.0 }
 0x436   : > { %942 = vadd.xlane.f32.xlu0 %v941_v25  ;;  %v938_v26 = vsel %vm925_vm4, %v2639_v23, 0.0 }
 0x437   : > { %2640 = vpow2.f32 %v1140_v24  ;;  %939 = vadd.xlane.f32.xlu1 %v938_v26 }
 0x438   : > { %2642 = vpow2.f32 %v1138_v30 }
 0x441   : > { %v2641_v27 = vpop.eup %2640 }
 0x442   : > { %v1145_v28 = vsel %vm925_vm4, %v2641_v27, 0.0  ;;  %v2643_v31 = vpop.eup %2642 }
 0x443   : > { %1146 = vadd.xlane.f32.xlu0 %v1145_v28  ;;  %v1142_v32 = vsel %vm925_vm4, %v2643_v31, 0.0 }
 0x448   : > { %2617 = vrot.lane.b32.xlu1 %v2935_v43, %s2726_s0  ;;  %s2735_s0 = smov 24  }
 0x459   : > { %2612 = vrot.lane.b32.xlu0 %v2935_v43, %s2727_s17 }
 0x45d   : > { %1241 = vrot.lane.b32.xlu0 %v2926_v40, %s2728_s30 }
 0x46c   : > { %1143 = vadd.xlane.f32.xlu1 %v1142_v32 }
 0x47d   : > { %1239 = vrot.lane.b32.xlu1 %v2928_v42, %s2728_s30 }
 0x4c3   : > { %v943_v33 = vpop.xlane.xlu0 %942 }
 0x4c4   : > { %2644 = vrcp.f32 %v943_v33  ;;  %v940_v34 = vpop.xlane.xlu1 %939 }
 0x4c5   : > { %2646 = vrcp.f32 %v940_v34 }
 0x4c8   : > { %v2618_v45 = vpop.permute.xlu1 %2617 }
 0x4c9   : > { %v2620_v48 = vunpack.i.h.bf16 %v2618_v45  ;;  %v2619_v49 = vunpack.i.l.bf16 %v2618_v45 }
 0x4cb   : > { %v2511_v53 = vpack.c.bf16 %v2620_v48, %v2619_v49 }
 0x4ce   : > { %v2645_v36 = vpop.eup %2644 }
 0x4cf   : > { %v2647_v38 = vpop.eup %2646  ;;  %v947_v44 = vmul.f32 %v2645_v36, %v2637_v22 }
 0x4d0   : > { %v1147_v39 = vpop.xlane.xlu0 %1146  ;;  %v946_v41 = vmul.f32 %v2647_v38, %v2639_v23 }
 0x4d1   : > { %2648 = vrcp.f32 %v1147_v39 }
 0x4d2   : > { %2397 = vmatprep.mubr.msk.f32.mxu0 %vm925_vm4, %v946_v41 }
 0x4d3   : > { %2398 = vmatmul.mubr.msk.f32.vlgmr.msra.gmra.mrb[0].mxu0 %vm925_vm4, %v947_v44 }
 0x4d4   : > { %v2613_v46 = vpop.permute.xlu0 %2612 }
 0x4d5   : > { %v2615_v50 = vunpack.i.h.bf16 %v2613_v46  ;;  %v2614_v51 = vunpack.i.l.bf16 %v2613_v46 }
 0x4d7   : > { %v2507_v52 = vpack.c.bf16 %v2615_v50, %v2614_v51 }
 0x4d8   : > { %v1242_v62 = vpop.permute.xlu0 %1241 }
 0x4d9   : > { %2508 = vmatprep.subr.bf16.mxu0 %v2507_v52 }
 0x4da   : > { %2510 = vmatpush3.bf16.msra.mxu0 %v2507_v52 }
 0x4db   : > { %2513 = vmatprep.subr.msk.bf16.mxu0 %vm2942_vm3, %v2511_v53  ;;  %v2649_v55 = vpop.eup %2648 }
 0x4dc   : > { %v1151_v60 = vmul.f32 %v2649_v55, %v2641_v27 }
 0x4f9   : > { %v1144_v54 = vpop.xlane.xlu1 %1143 }
 0x4fa   : > { %2650 = vrcp.f32 %v1144_v54 }
 0x4fd   : > { %v1240_v61 = vpop.permute.xlu1 %1239 }
 0x504   : > { %v2651_v57 = vpop.eup %2650 }
 0x505   : > { %v1150_v58 = vmul.f32 %v2651_v57, %v2643_v31 }
 0x507   : > { %2411 = vmatprep.mubr.msk.f32.mxu0 %vm925_vm4, %v1150_v58 }
 0x508   : > { %2412 = vmatmul.mubr.msk.f32.vlgmr.msra.gmra.mrb[2].mxu0 %vm925_vm4, %v1151_v60 }
 0x509   : > { %2516 = vmatpush3.bf16.xpose.msk.msra.mxu0 %vm2942_vm3, %v2511_v53  ;;  %2418 = vmatprep.mubr.msk.f32.mxu0 %vm837_vm2, %v1240_v61 }
 0x510   : > { %2419 = vmatmul.mubr.msk.f32.vlgmr.msra.gmra.mrb[4].mxu0 %vm837_vm2, %v1242_v62 }
 0x5a6   : > { %v2995_v63 = vpop.f32.mrb[0].mxu0 }
 0x5a7   : > { %v2997_v0 = vpop.f32.mrb[1].mxu0 }
 0x5db   : > { %v2999_v1 = vpop.f32.mrb[2].mxu0 }
 0x5dc   : > { %v3001_v2 = vpop.f32.mrb[3].mxu0 }
 0x5e3   : > { %v2420_v3 = vpop.f32.mrb[4].mxu0 }
 0x5e4   : > { %v1331_v4 = vmul.f32 0.35355338, %v2420_v3  ;;  %v1321_v5 = vpop.f32.mrb[5].mxu0 }
 0x5e5   : > { %v1330_v6 = vmul.f32 0.35355338, %v1321_v5 }
 0x5e6   : > { %v1333_v7 = vadd.f32 %v1331_v4, %v2961_v56 }
 0x5e7   : > { %v1332_v8 = vadd.f32 %v1330_v6, %v2966_v59 }
 0x5e8   : > { %v1337_v9 = vsel %vm925_vm4, %v1333_v7, -inf }
 0x5e9   : > { %1338 = vmax.xlane.f32.xlu0 %v1337_v9  ;;  %v1334_v10 = vsel %vm925_vm4, %v1332_v8, -inf  ;;  %v1680_v9 = vld [vmem:[%s3172_s29 + $0x10] sm:$0xff] }
 0x5ea   : > { %1335 = vmax.xlane.f32.xlu1 %v1334_v10 }
 0x676   : > { %v1339_v11 = vpop.xlane.xlu0 %1338 }
 0x677   : > { %v1341_v12 = vsub.f32 %v1333_v7, %v1339_v11  ;;  %v1336_v13 = vpop.xlane.xlu1 %1335  ;;  %v1678_v7 = vld [vmem:[%s3172_s29] sm:$0xff]  ;;  %v1681_v11 = vld [vmem:[%s3172_s29 + $0x18] sm:$0xff] }
 0x678   : > { %v1340_v14 = vsub.f32 %v1332_v8, %v1336_v13  ;;  %v1679_v8 = vld [vmem:[%s3172_s29 + $0x8] sm:$0xff] }
 0x679   : > { %v1344_v15 = vmul.f32 1.442695, %v1341_v12  ;;  %v2531_v10 = vpack.c.bf16 %v1679_v8, %v1678_v7  ;;  %v2535_v12 = vpack.c.bf16 %v1681_v11, %v1680_v9  ;;  %v1929_v7 = vld [vmem:[%s2876_s21 + $0x10] sm:$0xff]  ;;  %v1930_v8 = vld [vmem:[%s2876_s21 + $0x18] sm:$0xff]  ;;  %v1932_v11 = vld [vmem:[%s2876_s21 + $0x28] sm:$0xff] }
 0x67a   : > { %v1342_v16 = vmul.f32 1.442695, %v1340_v14  ;;  %v2551_v9 = vpack.c.bf16 %v1930_v8, %v1929_v7 }
 0x67b   : > { %2652 = vpow2.f32 %v1344_v15 }
 0x67c   : > { %2654 = vpow2.f32 %v1342_v16 }
 0x685   : > { %v2653_v17 = vpop.eup %2652 }
 0x686   : > { %v2655_v18 = vpop.eup %2654  ;;  %v1349_v19 = vsel %vm925_vm4, %v2653_v17, 0.0 }
 0x687   : > { %1350 = vadd.xlane.f32.xlu1 %v1349_v19  ;;  %v1346_v20 = vsel %vm925_vm4, %v2655_v18, 0.0 }
 0x688   : > { %1347 = vadd.xlane.f32.xlu0 %v1346_v20 }
 0x698   : > { %2627 = vrot.lane.b32.xlu1 %v2935_v43, %s2729_s18  ;;  %s3173_s18 = scalar_lea.vmem %s3141_s7, %s2834_s23 }
 0x69c   : > { %1443 = vrot.lane.b32.xlu1 %v2928_v42, %s2730_s20 }
 0x69e   : > { %2622 = vrot.lane.b32.xlu0 %v2935_v43, %s2731_s27 }
 0x6a2   : > { %1445 = vrot.lane.b32.xlu0 %v2926_v40, %s2730_s20 }
 0x714   : > { %v1351_v21 = vpop.xlane.xlu1 %1350 }
 0x715   : > { %2656 = vrcp.f32 %v1351_v21  ;;  %v1348_v22 = vpop.xlane.xlu0 %1347 }
 0x716   : > { %2658 = vrcp.f32 %v1348_v22 }
 0x718   : > { %v2628_v23 = vpop.permute.xlu1 %2627 }
 0x719   : > { %v2623_v24 = vpop.permute.xlu0 %2622  ;;  %v2630_v25 = vunpack.i.h.bf16 %v2628_v23  ;;  %v2629_v26 = vunpack.i.l.bf16 %v2628_v23 }
 0x71a   : > { %v2625_v27 = vunpack.i.h.bf16 %v2623_v24  ;;  %v2624_v28 = vunpack.i.l.bf16 %v2623_v24 }
 0x71b   : > { %v2521_v30 = vpack.c.bf16 %v2630_v25, %v2629_v26 }
 0x71c   : > { %v2517_v29 = vpack.c.bf16 %v2625_v27, %v2624_v28  ;;  %v1444_v33 = vpop.permute.xlu1 %1443 }
 0x71d   : > { %v1446_v34 = vpop.permute.xlu0 %1445 }
 0x71e   : > { %2518 = vmatprep.subr.bf16.mxu1 %v2517_v29 }
 0x71f   : > { %v2657_v31 = vpop.eup %2656  ;;  %2520 = vmatpush3.bf16.msra.mxu1 %v2517_v29 }
 0x720   : > { %v2659_v42 = vpop.eup %2658  ;;  %2523 = vmatprep.subr.msk.bf16.mxu1 %vm2942_vm3, %v2521_v30  ;;  %v1355_v32 = vmul.f32 %v2657_v31, %v2653_v17 }
 0x721   : > { %v1354_v40 = vmul.f32 %v2659_v42, %v2655_v18 }
 0x723   : > { %2425 = vmatprep.mubr.msk.f32.mxu1 %vm925_vm4, %v1354_v40 }
 0x724   : > { %2426 = vmatmul.mubr.msk.f32.vlgmr.msra.gmra.mrb[6].mxu1 %vm925_vm4, %v1355_v32 }
 0x725   : > { %2432 = vmatprep.mubr.msk.f32.mxu1 %vm837_vm2, %v1444_v33 }
 0x728   : > { %2526 = vmatpush3.bf16.xpose.msk.msra.mxu1 %vm2942_vm3, %v2521_v30 }
 0x72f   : > { %2433 = vmatmul.mubr.msk.f32.vlgmr.msra.gmra.mrb[8].mxu1 %vm837_vm2, %v1446_v34 }
 0x7f7   : > { %v2427_v36 = vpop.f32.mrb[6].mxu1 }
 0x7f8   : > { %v1434_v38 = vpop.f32.mrb[7].mxu1 }
 0x802   : > { %v2434_v39 = vpop.f32.mrb[8].mxu1 }
 0x803   : > { %v1535_v41 = vmul.f32 0.35355338, %v2434_v39  ;;  %v1525_v44 = vpop.f32.mrb[9].mxu1 }
 0x804   : > { %v1534_v45 = vmul.f32 0.35355338, %v1525_v44 }
 0x805   : > { %v1537_v46 = vadd.f32 %v1535_v41, %v2961_v56 }
 0x806   : > { %v1536_v48 = vadd.f32 %v1534_v45, %v2966_v59  ;;  %v1817_v45 = vld [vmem:[%s2866_s4] sm:$0xff] }
 0x807   : > { %v1541_v49 = vsel %vm925_vm4, %v1537_v46, -inf }
 0x808   : > { %1542 = vmax.xlane.f32.xlu0 %v1541_v49  ;;  %v1538_v50 = vsel %vm925_vm4, %v1536_v48, -inf  ;;  %v1819_v49 = vld [vmem:[%s2866_s4 + $0x10] sm:$0xff] }
 0x809   : > { %1539 = vmax.xlane.f32.xlu1 %v1538_v50  ;;  %v1820_v50 = vld [vmem:[%s2866_s4 + $0x18] sm:$0xff] }
 0x895   : > { %v1543_v47 = vpop.xlane.xlu0 %1542 }
 0x896   : > { %v1545_v51 = vsub.f32 %v1537_v46, %v1543_v47  ;;  %v1540_v52 = vpop.xlane.xlu1 %1539  ;;  %v1818_v46 = vld [vmem:[%s2866_s4 + $0x8] sm:$0xff]  ;;  %v2543_v47 = vpack.c.bf16 %v1820_v50, %v1819_v49 }
 0x897   : > { %v1544_v53 = vsub.f32 %v1536_v48, %v1540_v52  ;;  %v2539_v48 = vpack.c.bf16 %v1818_v46, %v1817_v45 }
 0x898   : > { %v1548_v54 = vmul.f32 1.442695, %v1545_v51 }
 0x899   : > { %v1546_v55 = vmul.f32 1.442695, %v1544_v53  ;;  %2540 = vmatprep.subr.bf16.mxu1 %v2539_v48 }
 0x89a   : > { %2660 = vpow2.f32 %v1548_v54  ;;  %2542 = vmatpush3.bf16.msra.mxu1 %v2539_v48 }
 0x89b   : > { %2662 = vpow2.f32 %v1546_v55  ;;  %2544 = vmatprep.subr.bf16.mxu1 %v2543_v47 }
 0x89e   : > { %2546 = vmatpush3.bf16.msra.mxu1 %v2543_v47 }
 0x8a4   : > { %v2661_v57 = vpop.eup %2660 }
 0x8a5   : > { %v2663_v58 = vpop.eup %2662  ;;  %v1553_v56 = vsel %vm925_vm4, %v2661_v57, 0.0 }
 0x8a6   : > { %1554 = vadd.xlane.f32.xlu1 %v1553_v56  ;;  %v1550_v59 = vsel %vm925_vm4, %v2663_v58, 0.0 }
 0x8a7   : > { %1551 = vadd.xlane.f32.xlu0 %v1550_v59 }
 0x8b7   : > { %1649 = vrot.lane.b32.xlu1 %v3001_v2, %s2732_s1 }
 0x8bb   : > { %1651 = vrot.lane.b32.xlu1 %v2999_v1, %s2732_s1  ;;  %s3174_s1 = scalar_lea.vmem %s3142_s8, %s2834_s23 }
 0x8bc   : > { %v2296_v56 = vld [vmem:[%s3174_s1] ss:$0 sm:$0xff] }
 0x8bd   : > { %2632 = vrot.lane.b32.xlu0 %v2935_v43, %s2733_s26 }
 0x8bf   : > { %1659 = vrot.lane.b32.xlu1 %v2427_v36, %s2734_s24 }
 0x8c1   : > { %1657 = vrot.lane.b32.xlu0 %v1434_v38, %s2734_s24  ;;  %s3175_s24 = scalar_lea.vmem %s3143_s9, %s2834_s23 }
 0x933   : > { %v1555_v60 = vpop.xlane.xlu1 %1554 }
 0x934   : > { %2664 = vrcp.f32 %v1555_v60  ;;  %v1552_v61 = vpop.xlane.xlu0 %1551  ;;  %v2297_v60 = vld [vmem:[%s3175_s24] ss:$0 sm:$0xff] }
 0x935   : > { %2666 = vrcp.f32 %v1552_v61 }
 0x937   : > { %v1650_v15 = vpop.permute.xlu1 %1649 }
 0x938   : > { %v2633_v62 = vpop.permute.xlu0 %2632  ;;  %v1671_v19 = vsel %vm837_vm2, %v2997_v0, %v1650_v15  ;;  %v2293_v0 = vld [vmem:[%s3173_s18] ss:$0 sm:$0xff] }
 0x939   : > { %v2635_v3 = vunpack.i.h.bf16 %v2633_v62  ;;  %v2634_v4 = vunpack.i.l.bf16 %v2633_v62 }
 0x93b   : > { %v2527_v2 = vpack.c.bf16 %v2635_v3, %v2634_v4  ;;  %v1652_v16 = vpop.permute.xlu1 %1651 }
 0x93c   : > { %v1658_v18 = vpop.permute.xlu0 %1657  ;;  %v1672_v21 = vsel %vm837_vm2, %v2995_v63, %v1652_v16  ;;  %v2298_v16 = vld [vmem:[%s665_s6] ss:$0 sm:$0xff] }
 0x93d   : > { %2528 = vmatprep.subr.bf16.mxu0 %v2527_v2  ;;  %v1673_v22 = vsel %vm925_vm4, %v1671_v19, %v1658_v18 }
 0x93e   : > { %v2665_v1 = vpop.eup %2664  ;;  %2530 = vmatpush3.bf16.msra.mxu0 %v2527_v2 }
 0x93f   : > { %v2667_v5 = vpop.eup %2666  ;;  %v1559_v6 = vmul.f32 %v2665_v1, %v2661_v57  ;;  %2532 = vmatprep.subr.bf16.mxu0 %v2531_v10  ;;  %v1660_v17 = vpop.permute.xlu1 %1659 }
 0x940   : > { %v1558_v43 = vmul.f32 %v2667_v5, %v2663_v58  ;;  %v1674_v24 = vsel %vm925_vm4, %v1672_v21, %v1660_v17  ;;  %v1927_v5 = vld [vmem:[%s2876_s21] sm:$0xff] }
 0x942   : > { %2439 = vmatprep.mubr.msk.f32.mxu0 %vm925_vm4, %v1558_v43  ;;  %v1928_v43 = vld [vmem:[%s2876_s21 + $0x8] sm:$0xff] }
 0x943   : > { %2440 = vmatmul.mubr.msk.f32.vlgmr.msra.gmra.mrb[6].mxu0 %vm925_vm4, %v1559_v6  ;;  %v2547_v6 = vpack.c.bf16 %v1928_v43, %v1927_v5  ;;  %v2305_v5 = vld [vmem:[%s679_s3] ss:$0 sm:$0xff] }
 0x944   : > { %2534 = vmatpush3.bf16.msra.mxu0 %v2531_v10  ;;  %v1931_v10 = vld [vmem:[%s2876_s21 + $0x20] sm:$0xff] }
 0x945   : > { %2536 = vmatprep.subr.bf16.mxu0 %v2535_v12 }
 0x948   : > { %2538 = vmatpush3.bf16.msra.mxu0 %v2535_v12  ;;  %v2555_v12 = vpack.c.bf16 %v1932_v11, %v1931_v10 }
 0x949   : > { %2548 = vmatprep.subr.bf16.mxu0 %v2547_v6 }
 0xa16   : > { %v2441_v13 = vpop.f32.mrb[6].mxu0 }
 0xa17   : > { %1667 = vrot.lane.b32.xlu1 %v2441_v13, %s2735_s0  ;;  %v1638_v14 = vpop.f32.mrb[7].mxu0  ;;  %v1933_v13 = vld [vmem:[%s2876_s21 + $0x30] sm:$0xff] }
 0xa18   : > { %1665 = vrot.lane.b32.xlu0 %v1638_v14, %s2735_s0  ;;  %v1934_v14 = vld [vmem:[%s2876_s21 + $0x38] sm:$0xff] }
 0xa19   : > { %v2559_v15 = vpack.c.bf16 %v1934_v14, %v1933_v13 }
 0xa89   : > { %v1668_v20 = vpop.permute.xlu1 %1667 }
 0xa8a   : > { %v1666_v23 = vpop.permute.xlu0 %1665  ;;  %v1677_v26 = vsel %vm1675_vm5, %v1674_v24, %v1668_v20 }
 0xa8b   : > { %v1676_v25 = vsel %vm1675_vm5, %v1673_v22, %v1666_v23 }
 0xa8c   : > { %2450 = vmatprep.mubr.msk.f32.mxu0 %vm747_vm1, %v1676_v25 }
 0xa8d   : > { %2451 = vmatmul.mubr.msk.f32.vlgmr.msra.gmra.mrb[8].mxu0 %vm747_vm1, %v1677_v26 }
 0xa8e   : > { %2550 = vmatpush3.bf16.msra.mxu0 %v2547_v6 }
 0xa8f   : > { %2552 = vmatprep.subr.bf16.mxu0 %v2551_v9 }
 0xa92   : > { %2554 = vmatpush3.bf16.msra.mxu0 %v2551_v9 }
 0xa93   : > { %2556 = vmatprep.subr.bf16.mxu0 %v2555_v12 }
 0xa96   : > { %2558 = vmatpush3.bf16.msra.mxu0 %v2555_v12 }
 0xa97   : > { %2560 = vmatprep.subr.bf16.mxu0 %v2559_v15 }
 0xa9a   : > { %2562 = vmatpush3.bf16.msra.mxu0 %v2559_v15 }
 0xb60   : > { %v2452_v27 = vpop.f32.mrb[8].mxu0 }
 0xb61   : > { %v1767_v28 = vadd.f32 %v2452_v27, %v2293_v0  ;;  %v1761_v29 = vpop.f32.mrb[9].mxu0 }
 0xb62   : > { %v1762_v63 = vadd.f32 %v2293_v0, %v1761_v29 }
 0xb63   : > { %v1771_v30 = vadd.f32 %v1767_v28, %v2917_v37 }
 0xb64   : > { %v1770_v31 = vadd.f32 %v1762_v63, %v2913_v35 }
 0xb65   : > { %v1777_v42 = vsel %vm747_vm1, %v1771_v30, 0.0 }
 0xb66   : > { %1778 = vadd.xlane.f32.xlu1 %v1777_v42  ;;  %v1774_v40 = vsel %vm747_vm1, %v1770_v31, 0.0 }
 0xb67   : > { %1775 = vadd.xlane.f32.xlu0 %v1774_v40 }
 0xbf3   : > { %v1779_v32 = vpop.xlane.xlu1 %1778 }
 0xbf4   : > { %v1782_v33 = vmul.f32 0.03125, %v1779_v32  ;;  %v1776_v34 = vpop.xlane.xlu0 %1775 }
 0xbf5   : > { %v1781_v36 = vmul.f32 0.03125, %v1776_v34 }
 0xbf6   : > { %v1784_v38 = vsub.f32 %v1771_v30, %v1782_v33 }
 0xbf7   : > { %v1783_v39 = vsub.f32 %v1770_v31, %v1781_v36  ;;  %v2301_v36 = vld [vmem:[%s673_s25] ss:$0 sm:$0xff] }
 0xbf8   : > { %v1786_v35 = vmul.f32 %v1784_v38, %v1784_v38 }
 0xbf9   : > { %v1785_v41 = vmul.f32 %v1783_v39, %v1783_v39 }
 0xbfa   : > { %v1790_v44 = vsel %vm747_vm1, %v1786_v35, 0.0 }
 0xbfb   : > { %v1787_v37 = vsel %vm747_vm1, %v1785_v41, 0.0 }
 0xbfc   : > { %1788 = vadd.xlane.f32.xlu0 %v1787_v37 }
 0xc00   : > { %1791 = vadd.xlane.f32.xlu0 %v1790_v44 }
 0xc89   : > { %v1789_v51 = vpop.xlane.xlu0 %1788 }
 0xc8a   : > { %v1793_v52 = vmul.f32 0.03125, %v1789_v51 }
 0xc8c   : > { %v1795_v53 = vadd.f32 1e-12, %v1793_v52 }
 0xc8d   : > { %v1792_v54 = vpop.xlane.xlu0 %1791 }
 0xc8e   : > { %2668 = vrsqrt.f32 %v1795_v53  ;;  %v1794_v55 = vmul.f32 0.03125, %v1792_v54 }
 0xc90   : > { %v1796_v57 = vadd.f32 1e-12, %v1794_v55 }
 0xc92   : > { %2670 = vrsqrt.f32 %v1796_v57 }
 0xc98   : > { %v2669_v58 = vpop.eup %2668 }
 0xc99   : > { %v1799_v59 = vmul.f32 %v2669_v58, %v1783_v39 }
 0xc9b   : > { %v1807_v61 = vmul.f32 %v2296_v56, %v1799_v59 }
 0xc9c   : > { %v2671_v62 = vpop.eup %2670 }
 0xc9d   : > { %v1800_v3 = vmul.f32 %v2671_v62, %v1784_v38  ;;  %v1815_v4 = vadd.f32 %v2297_v60, %v1807_v61 }
 0xc9f   : > { %v1808_v2 = vmul.f32 %v2296_v56, %v1800_v3  ;;  %2461 = vmatprep.mubr.msk.f32.mxu1 %vm747_vm1, %v1815_v4 }
 0xca1   : > { %v1816_v1 = vadd.f32 %v2297_v60, %v1808_v2 }
 0xca3   : > { %2462 = vmatmul.mubr.msk.f32.vlgmr.msra.gmra.mrb[10].mxu1 %vm747_vm1, %v1816_v1 }
 0xd76   : > { %v2463_v17 = vpop.f32.mrb[10].mxu1 }
 0xd77   : > { %v1906_v18 = vadd.f32 %v2463_v17, %v2298_v16  ;;  %v1900_v19 = vpop.f32.mrb[11].mxu1 }
 0xd78   : > { %v1901_v20 = vadd.f32 %v2298_v16, %v1900_v19 }
 0xd79   : > { %v1912_v21 = vmul.f32 0.044715, %v1906_v18  ;;  %v1910_v32 = vmul.f32 0.5, %v1906_v18 }
 0xd7a   : > { %v1911_v22 = vmul.f32 0.044715, %v1901_v20  ;;  %v1909_v42 = vmul.f32 0.5, %v1901_v20 }
 0xd7b   : > { %v1914_v23 = vmul.f32 %v1912_v21, %v1906_v18 }
 0xd7c   : > { %v1913_v24 = vmul.f32 %v1911_v22, %v1901_v20 }
 0xd7d   : > { %v1916_v25 = vmul.f32 %v1914_v23, %v1906_v18 }
 0xd7e   : > { %v1915_v26 = vmul.f32 %v1913_v24, %v1901_v20 }
 0xd7f   : > { %v1918_v0 = vadd.f32 %v1916_v25, %v1906_v18 }
 0xd80   : > { %v1917_v27 = vadd.f32 %v1915_v26, %v1901_v20 }
 0xd81   : > { %v1920_v28 = vmul.f32 0.7978846, %v1918_v0 }
 0xd82   : > { %v1919_v29 = vmul.f32 0.7978846, %v1917_v27 }
 0xd83   : > { %2672 = vtanh.f32 %v1920_v28 }
 0xd84   : > { %2674 = vtanh.f32 %v1919_v29 }
 0xd8d   : > { %v2673_v63 = vpop.eup %2672 }
 0xd8e   : > { %v2675_v30 = vpop.eup %2674  ;;  %v1924_v31 = vadd.f32 1.0, %v2673_v63 }
 0xd8f   : > { %v1923_v40 = vadd.f32 1.0, %v2675_v30 }
 0xd90   : > { %v1926_v34 = vmul.f32 %v1924_v31, %v1910_v32 }
 0xd91   : > { %v1925_v33 = vmul.f32 %v1923_v40, %v1909_v42 }
 0xd93   : > { %2480 = vmatprep.mubr.msk.f32.mxu0 %vm1942_vm6, %v1925_v33 }
 0xd94   : > { %2481 = vmatmul.mubr.msk.f32.vlgmr.msra.gmra.mrb[10].mxu0 %vm1942_vm6, %v1926_v34 }
 0xe67   : > { %v2482_v38 = vpop.f32.mrb[10].mxu0 }
 0xe68   : > { %v2021_v39 = vadd.f32 %v2482_v38, %v2301_v36  ;;  %v2015_v41 = vpop.f32.mrb[11].mxu0 }
 0xe69   : > { %v2016_v37 = vadd.f32 %v2301_v36, %v2015_v41 }
 0xe6a   : > { %v2025_v35 = vadd.f32 %v2021_v39, %v1816_v1 }
 0xe6b   : > { %v2024_v44 = vadd.f32 %v2016_v37, %v1815_v4  ;;  %v2304_v4 = vld [vmem:[%s676_s28] ss:$0 sm:$0xff] }
 0xe6c   : > { %v2031_v45 = vsel %vm747_vm1, %v2025_v35, 0.0 }
 0xe6d   : > { %2032 = vadd.xlane.f32.xlu0 %v2031_v45  ;;  %v2028_v46 = vsel %vm747_vm1, %v2024_v44, 0.0 }
 0xe6e   : > { %2029 = vadd.xlane.f32.xlu1 %v2028_v46 }
 0xefa   : > { %v2033_v48 = vpop.xlane.xlu0 %2032 }
 0xefb   : > { %v2035_v49 = vmul.f32 0.03125, %v2033_v48  ;;  %v2030_v50 = vpop.xlane.xlu1 %2029 }
 0xefc   : > { %v2034_v47 = vmul.f32 0.03125, %v2030_v50 }
 0xefd   : > { %v2037_v51 = vsub.f32 %v2025_v35, %v2035_v49 }
 0xefe   : > { %v2036_v52 = vsub.f32 %v2024_v44, %v2034_v47 }
 0xeff   : > { %v2039_v53 = vmul.f32 %v2037_v51, %v2037_v51 }
 0xf00   : > { %v2038_v54 = vmul.f32 %v2036_v52, %v2036_v52 }
 0xf01   : > { %v2043_v55 = vsel %vm747_vm1, %v2039_v53, 0.0 }
 0xf02   : > { %2044 = vadd.xlane.f32.xlu0 %v2043_v55  ;;  %v2040_v57 = vsel %vm747_vm1, %v2038_v54, 0.0 }
 0xf03   : > { %2041 = vadd.xlane.f32.xlu1 %v2040_v57 }
 0xf8f   : > { %v2045_v58 = vpop.xlane.xlu0 %2044 }
 0xf90   : > { %v2047_v56 = vmul.f32 0.03125, %v2045_v58  ;;  %v2042_v59 = vpop.xlane.xlu1 %2041 }
 0xf91   : > { %v2046_v60 = vmul.f32 0.03125, %v2042_v59 }
 0xf92   : > { %v2049_v61 = vadd.f32 1e-12, %v2047_v56 }
 0xf93   : > { %v2048_v62 = vadd.f32 1e-12, %v2046_v60 }
 0xf94   : > { %2676 = vrsqrt.f32 %v2049_v61 }
 0xf95   : > { %2678 = vrsqrt.f32 %v2048_v62 }
 0xf9e   : > { %v2677_v3 = vpop.eup %2676 }
 0xf9f   : > { %v2679_v2 = vpop.eup %2678  ;;  %v2053_v1 = vmul.f32 %v2677_v3, %v2037_v51 }
 0xfa0   : > { %v2052_v43 = vmul.f32 %v2679_v2, %v2036_v52  ;;  %2075 = sbr.rel (%p2306_p5) target bundleno = 4184 (0x1058), region = 92 }
 0xfa1   : > { %v2061_v6 = vmul.f32 %v2304_v4, %v2053_v1 }
 0xfa2   : > { %v2060_v7 = vmul.f32 %v2304_v4, %v2052_v43 }
 0xfa3   : > { %v2069_v8 = vadd.f32 %v2305_v5, %v2061_v6 }
 0xfa4   : > { %v2068_v9 = vadd.f32 %v2305_v5, %v2060_v7 }
 0xfa5   : > { %2071 = vst.msk [vmem:[#allocation2 + $0x8] sm:$0xff] %vm747_vm1, %v2069_v8  ;;  %v2077_v10 = vrot.slane (!%p2306_p5), %v2069_v8, 7 }
 0xfa6   : > { %2070 = vst.msk [vmem:[#allocation2] sm:$0xff] %vm747_vm1, %v2068_v9 }
 0xfa7   : > { %v2080_v11 = vsel %vm2079_vm7, %v2068_v9, %v2077_v10 }
 0xfa8   : > { %v2081_v12 = vmul.f32 %v2080_v11, %v2080_v11 }
 0xfaa   : > { %v2083_v13 = vsel %vm2082_vm8, %v2081_v12, 0.0 }
 0xfab   : > { %2084 = vadd.xlane.f32.xlu0 %v2083_v13 }
0x1038   : > { %v2085_v14 = vpop.xlane.xlu0 %2084 }
0x1039   : > { %2680 = vrsqrt.f32 %v2085_v14  ;;  %vm2088_vm9 = vcmp.eq.f32.partialorder %v2085_v14, inf  ;;  %v2091_v17 = vand.u32 2147483648, %v2085_v14  ;;  %vm2090_vm10 = vcmp.eq.f32.partialorder %v2085_v14, 0.0 }
0x1043   : > { %v2681_v15 = vpop.eup %2680 }
0x1044   : > { %v2087_v16 = vmul.f32 %v2681_v15, %v2085_v14 }
0x1046   : > { %v2089_v18 = vsel %vm2088_vm9, %v2085_v14, %v2087_v16 }
0x1047   : > { %v2092_v19 = vsel %vm2090_vm10, %v2091_v17, %v2089_v18 }
0x1048   : > { %v2093_v20 = vmax.f32 %v2092_v19, 1e-12 }
0x104a   : > { %2682 = vrcp.f32 %v2093_v20 }
0x1054   : > { %v2683_v21 = vpop.eup %2682 }
0x1055   : > { %v2095_v22 = vmul.f32 %v2683_v21, %v2080_v11 }
0x1057   : > { %2096 = vst.msk [vmem:[#allocation3] sm:$0x3] %vm2082_vm8, %v2095_v22 }
0x1058 PF: > { %p2567_p6 = scmp.eq.s32.totalorder %s2828_s22, 1  ;;  %s2736_s3 = smov [#allocation3]  }
0x1059   : > { %s2104_s23 = sshll.u32 %s2736_s3, 4  ;;  %s2105_s23 = int_to_ptr.vmem [resolvable:$true] %s2104_s23 }
0x105a   : > { %s2684_s28 = scalar_lea.vmem %s2105_s23, 32  ;;  %p2691_p10 = scmp.lt.s32.totalorder %s2105_s23, %s2105_s23 }
0x105b   : > { %p2685_p7 = scmp.ne.s32.totalorder %s2105_s23, %s2684_s28  ;;  %p2692_p11 = scmp.lt.s32.totalorder %s2684_s28, %s2684_s28 }
0x105d   : > { %p2686_p8 = pnand %p2685_p7, %p2567_p6  ;;  %p2693_p12 = por %p2692_p11, %p2691_p10 }
0x105f   : > { %p2687_p9 = pneg %p2686_p8 }
0x1061   : > { %p2694_p13 = pnand %p2693_p12, %p2687_p9 }
0x1063   : > { %2697 = shalt.err (!%p2694_p13)
}
0x1064   : > { %s3176_s1 = sld [smem:[#allocation13_spill]] }
0x106a   : > { %s2698_s4 = scalar_lea.hbm %s3176_s1, 32 }
0x106b   : > { %p2699_p0 = scmp.ne.s32.totalorder %s3176_s1, %s2698_s4  ;;  %p2704_p3 = scmp.lt.u32.totalorder %s2698_s4, %s3176_s1 }
0x106d   : > { %p2700_p1 = pnand %p2699_p0, %p2567_p6 }
0x106f   : > { %p2701_p2 = pneg %p2700_p1 }
0x1071   : > { %p2706_p4 = pnand %p2704_p3, %p2701_p2 }
0x1073   : > { %2709 = shalt.err (!%p2706_p4)
}
0x1074   : > { %2564 = dma.vmem_to_hbm [thread:$0]  (%p2567_p6), %s2105_s23, 32, %s3176_s1, [#allocation4]  }
0x1075   : > { %2715 = dma.done.wait (%p2567_p6), [#allocation4], 32  }
0x1076   : > { %2717 = vsyncadd (%p2567_p6), [#allocation4], 4294967264 }
0x1077 PF: > { %s3177_s25 = sld [smem:[#allocation6_spill]] }
0x107d   : > { %s27_s21 = sadd.s32 1, %s3177_s25  }
0x107e   : > { %p24_p5 = scmp.ge.s32.totalorder %s27_s21, 4  }
0x1080   :  { %26 = sbr.rel (!%p24_p5) target bundleno = 8 (0x8), region = 152 }
0x1087   :  { %2117 = vsyncpa [#allocation4], 1 }
0x1088   :  { %2119 = vsyncpa [#allocation4 + $0x1], 1 }

</bundles_post_ra>
